<compile_context>
chip_gen: v6e
topology: v6e:2x2x1
jax: 0.10.0
libtpu: 0.0.40
codegen_flags: <defaults>
</compile_context>

<pallas_src>
import functools

import jax
import jax.numpy as jnp
from jax.experimental import pallas as pl
from jax.experimental.pallas import tpu as pltpu


def coord_att_kernel(x_ref, pool_ref, eh_ref, ew_ref,
                     fc1_ref, fc2_ref, c1w_ref, c1b_ref,
                     chw_ref, chb_ref, cww_ref, cwb_ref,
                     out_ref, *, H, W):
    C, HW = x_ref.shape
    P = H + W

    # Single lane-dense load used only for the pooling stage (live range ends
    # right after; the final multiply re-reads the ref instead).
    x = x_ref[...]                                                   # (C, HW)

    # --- pooling ------------------------------------------------------------
    # Avg pools on the (otherwise idle) MXU; the columns of pool_ref are
    # ordered [avg-over-W for each h | avg-over-H for each w], so `avg` is
    # already the concatenated (C, H+W) matrix with no lane concat needed.
    avg = jnp.dot(x, pool_ref[...], preferred_element_type=jnp.float32)   # (C, P)

    # Max pools stay on the XLU (one reshape of the value; avg no longer
    # needs it).  TODO(synk): stream this over H-chunks for huge HW.
    x4 = x.reshape(C, H, W)
    mx = jnp.concatenate([x4.max(axis=2), x4.max(axis=1)], axis=-1)       # (C, P)

    # --- shared squeeze-excite MLP: fc2(relu(fc1(.))) on avg and max ---------
    # Pure 2-D dots, weights used directly (no broadcast_to).  Kept in f32 to
    # match the reference bit-for-bit; production could cast operands to bf16.
    def se(v):                                                            # (C, P)
        h1 = jnp.maximum(
            jnp.dot(fc1_ref[...], v, preferred_element_type=jnp.float32), 0.0)
        return jnp.dot(fc2_ref[...], h1, preferred_element_type=jnp.float32)

    y = jax.nn.sigmoid(se(avg) + se(mx))                                  # (C, P) = [x_A | y_A]

    # --- conv1 (+ folded BN1 + bias) -> h_swish ------------------------------
    t = jnp.dot(c1w_ref[...], y, preferred_element_type=jnp.float32) + c1b_ref[...]
    # h_swish as written in the module: x * relu6(x + 2) / 4
    t = t * (jnp.clip(t + 2.0, 0.0, 6.0) * 0.25)                          # (mip, P)

    # --- conv_h / conv_w -> sigmoid gates ------------------------------------
    a_h = jax.nn.sigmoid(
        jnp.dot(chw_ref[...], t[:, :H], preferred_element_type=jnp.float32)
        + chb_ref[...])                                                   # (C, H)
    a_w = jax.nn.sigmoid(
        jnp.dot(cww_ref[...], t[:, H:], preferred_element_type=jnp.float32)
        + cwb_ref[...])                                                   # (C, W)

    # --- lane-dense gate via 0/1 expansion matmuls ---------------------------
    # gate[c, h*W + w] = a_h[c, h] * a_w[c, w], built on the MXU (no rank-4
    # outer product, no reshape of an HW-sized tensor).
    gate = (jnp.dot(a_h, eh_ref[...], preferred_element_type=jnp.float32)
            * jnp.dot(a_w, ew_ref[...], preferred_element_type=jnp.float32))  # (C, HW)

    # Re-read the already-resident VMEM block for the final multiply so `x`
    # is not held live across the whole kernel (cuts vreg pressure / spills).
    out_ref[...] = (x_ref[...] * gate).astype(out_ref.dtype)


def coord_att(x, params, *, vmem_cap_bytes=56 << 20):
    """CoordAtt forward. x: (N, C, H, W) NCHW, same as the PyTorch module."""
    N, C, H, W = x.shape
    OUP = params["conv_h_w"].shape[0]
    assert OUP == C, "final broadcasted multiply requires oup == inp"
    HW = H * W

    # Fold BatchNorm (inference) and the conv1 bias into one weight/bias pair.
    c1w_eff = params["bn_scale"] * params["conv1_w"]                         # (mip, C)
    c1b_eff = params["bn_scale"] * params["conv1_b"] + params["bn_shift"]    # (mip, 1)

    # Constant pooling / expansion matrices (host-built, loaded into VMEM once
    # thanks to the constant index_map).
    hw_idx = jnp.arange(HW)
    E_h = (hw_idx[None, :] // W == jnp.arange(H)[:, None]).astype(jnp.float32)   # (H, HW)
    E_w = (hw_idx[None, :] % W == jnp.arange(W)[:, None]).astype(jnp.float32)    # (W, HW)
    P_pool = jnp.concatenate([E_h.T / W, E_w.T / H], axis=1)                     # (HW, H+W)

    consts = [P_pool, E_h, E_w,
              params["fc1_w"], params["fc2_w"], c1w_eff, c1b_eff,
              params["conv_h_w"], params["conv_h_b"],
              params["conv_w_w"], params["conv_w_b"]]

    # Lane-dense layout: flatten H*W onto the lane axis (multiple of 128 for
    # typical shapes -> dense DMAs and unmasked full-width output stores).
    x_flat = x.reshape(N, C, HW)

    def const_spec(a):
        return pl.BlockSpec(a.shape, lambda n, _nd=a.ndim: (0,) * _nd)

    # VMEM budget: ~ double-buffered in + out blocks + gate/pool intermediates
    # + constants, with headroom; capped so it stays legal on v7x (64 MiB
    # physical).  On v5e/v6e (128 MiB) the cap could be raised further.
    block_bytes = C * HW * x.dtype.itemsize
    vmem_limit = int(min(max(32 << 20, 8 * block_bytes), vmem_cap_bytes))

    kernel = functools.partial(coord_att_kernel, H=H, W=W)

    # One image per grid step: keeps every matmul 2-D, keeps per-step VMEM
    # small, and gives >= 2 "parallel" steps for N >= 2 (v7x megacore).
    out_flat = pl.pallas_call(
        kernel,
        out_shape=jax.ShapeDtypeStruct((N, OUP, HW), x.dtype),
        grid=(N,),
        in_specs=[pl.BlockSpec((None, C, HW), lambda n: (n, 0, 0))]
                 + [const_spec(a) for a in consts],
        out_specs=pl.BlockSpec((None, OUP, HW), lambda n: (n, 0, 0)),
        compiler_params=pltpu.CompilerParams(
            dimension_semantics=("parallel",),
            vmem_limit_bytes=vmem_limit),
    )(x_flat, *consts)
    return out_flat.reshape(N, OUP, H, W)


def coord_att_ref(x, p):
    """Plain-JAX reference (mirrors the PyTorch forward, unfolded params)."""
    N, C, H, W = x.shape

    def se(v):  # (N, C, L)
        h = jnp.maximum(jnp.einsum("rc,ncl->nrl", p["fc1_w"], v), 0.0)
        return jnp.einsum("cr,nrl->ncl", p["fc2_w"], h)

    xh_avg, xh_max = x.mean(3), x.max(3)            # (N, C, H)
    xw_avg, xw_max = x.mean(2), x.max(2)            # (N, C, W)
    x_A = jax.nn.sigmoid(se(xh_avg) + se(xh_max))   # (N, C, H)
    y_A = jax.nn.sigmoid(se(xw_avg) + se(xw_max))   # (N, C, W)

    y = jnp.concatenate([x_A, y_A], axis=2)         # (N, C, H+W)
    y = jnp.einsum("mc,ncl->nml", p["conv1_w"], y) + p["conv1_b"][None]
    y = y * p["bn_scale"][None] + p["bn_shift"][None]
    y = y * (jnp.clip(y + 2.0, 0.0, 6.0) * 0.25)
    xA, yA = y[:, :, :H], y[:, :, H:]
    a_h = jax.nn.sigmoid(
        jnp.einsum("om,nml->nol", p["conv_h_w"], xA) + p["conv_h_b"][None])
    a_w = jax.nn.sigmoid(
        jnp.einsum("om,nml->nol", p["conv_w_w"], yA) + p["conv_w_b"][None])
    return x * a_w[:, :, None, :] * a_h[:, :, :, None]


def make_params(key, inp, oup, reduction):
    c_red = inp // reduction
    assert c_red >= 1, "pick inp >= reduction for a valid fc1"
    mip = max(8, c_red)
    ks = jax.random.split(key, 12)

    fc1_w = 0.2 * jax.random.normal(ks[0], (c_red, inp), jnp.float32)
    fc2_w = 0.2 * jax.random.normal(ks[1], (inp, c_red), jnp.float32)
    conv1_w = 0.2 * jax.random.normal(ks[2], (mip, inp), jnp.float32)
    conv1_b = 0.1 * jax.random.normal(ks[3], (mip, 1), jnp.float32)
    conv_h_w = 0.2 * jax.random.normal(ks[4], (oup, mip), jnp.float32)
    conv_h_b = 0.1 * jax.random.normal(ks[5], (oup, 1), jnp.float32)
    conv_w_w = 0.2 * jax.random.normal(ks[6], (oup, mip), jnp.float32)
    conv_w_b = 0.1 * jax.random.normal(ks[7], (oup, 1), jnp.float32)

    # BatchNorm2d(mip) in inference form, folded into scale/shift (glue).
    gamma = 1.0 + 0.1 * jax.random.normal(ks[8], (mip, 1), jnp.float32)
    beta = 0.1 * jax.random.normal(ks[9], (mip, 1), jnp.float32)
    run_mean = 0.1 * jax.random.normal(ks[10], (mip, 1), jnp.float32)
    run_var = jnp.abs(1.0 + 0.1 * jax.random.normal(ks[11], (mip, 1),
                                                    jnp.float32))
    eps = 1e-5
    bn_scale = gamma / jnp.sqrt(run_var + eps)
    bn_shift = beta - run_mean * bn_scale

    return dict(fc1_w=fc1_w, fc2_w=fc2_w,
                conv1_w=conv1_w, conv1_b=conv1_b,
                bn_scale=bn_scale, bn_shift=bn_shift,
                conv_h_w=conv_h_w, conv_h_b=conv_h_b,
                conv_w_w=conv_w_w, conv_w_b=conv_w_b)


if __name__ == "__main__":
    # Small shapes consistent with the module: inp == oup, inp // reduction >= 1.
    N, C, H, W = 2, 16, 16, 16
    REDUCTION = 4            # -> c_red = 4, mip = max(8, 4) = 8
    OUP = C

    key = jax.random.PRNGKey(0)
    kx, kp = jax.random.split(key)
    x = jax.random.normal(kx, (N, C, H, W), jnp.float32)
    params = make_params(kp, C, OUP, REDUCTION)

    out = jax.block_until_ready(coord_att(x, params))
    ref = jax.block_until_ready(coord_att_ref(x, params))

    assert out.shape == (N, OUP, H, W)
    assert jnp.allclose(out, ref, rtol=1e-3, atol=1e-3), (
        float(jnp.max(jnp.abs(out - ref))))
    print("KERNEL_OK")
</pallas_src>

<mosaic_0001>
module attributes {stable_mosaic.version = 11 : i64} {
  func.func @coord_att_kernel(%arg0: i32, %arg1: memref<1x16x256xf32, #tpu.memory_space<vmem>>, %arg2: memref<256x32xf32, #tpu.memory_space<vmem>>, %arg3: memref<16x256xf32, #tpu.memory_space<vmem>>, %arg4: memref<16x256xf32, #tpu.memory_space<vmem>>, %arg5: memref<4x16xf32, #tpu.memory_space<vmem>>, %arg6: memref<16x4xf32, #tpu.memory_space<vmem>>, %arg7: memref<8x16xf32, #tpu.memory_space<vmem>>, %arg8: memref<8x1xf32, #tpu.memory_space<vmem>>, %arg9: memref<16x8xf32, #tpu.memory_space<vmem>>, %arg10: memref<16x1xf32, #tpu.memory_space<vmem>>, %arg11: memref<16x8xf32, #tpu.memory_space<vmem>>, %arg12: memref<16x1xf32, #tpu.memory_space<vmem>>, %arg13: memref<1x16x256xf32, #tpu.memory_space<vmem>>) attributes {dimension_semantics = [#tpu.dimension_semantics<parallel>], iteration_bounds = array<i64: 2>, scalar_prefetch = 0 : i64, scratch_operands = 0 : i64, tpu.core_type = #tpu.core_type<tc>, window_params = [{transform_indices = @transform_0, window_bounds = array<i64: 1, 16, 256>}, {pipeline_mode = #tpu.pipeline_mode<synchronous>, transform_indices = @transform_1, window_bounds = array<i64: 256, 32>}, {pipeline_mode = #tpu.pipeline_mode<synchronous>, transform_indices = @transform_2, window_bounds = array<i64: 16, 256>}, {pipeline_mode = #tpu.pipeline_mode<synchronous>, transform_indices = @transform_3, window_bounds = array<i64: 16, 256>}, {pipeline_mode = #tpu.pipeline_mode<synchronous>, transform_indices = @transform_4, window_bounds = array<i64: 4, 16>}, {pipeline_mode = #tpu.pipeline_mode<synchronous>, transform_indices = @transform_5, window_bounds = array<i64: 16, 4>}, {pipeline_mode = #tpu.pipeline_mode<synchronous>, transform_indices = @transform_6, window_bounds = array<i64: 8, 16>}, {pipeline_mode = #tpu.pipeline_mode<synchronous>, transform_indices = @transform_7, window_bounds = array<i64: 8, 1>}, {pipeline_mode = #tpu.pipeline_mode<synchronous>, transform_indices = @transform_8, window_bounds = array<i64: 16, 8>}, {pipeline_mode = #tpu.pipeline_mode<synchronous>, transform_indices = @transform_9, window_bounds = array<i64: 16, 1>}, {pipeline_mode = #tpu.pipeline_mode<synchronous>, transform_indices = @transform_10, window_bounds = array<i64: 16, 8>}, {pipeline_mode = #tpu.pipeline_mode<synchronous>, transform_indices = @transform_11, window_bounds = array<i64: 16, 1>}, {transform_indices = @transform_12, window_bounds = array<i64: 1, 16, 256>}]} {
    %c0 = arith.constant 0 : index
    %c0_0 = arith.constant 0 : index
    %c0_1 = arith.constant 0 : index
    %0 = vector.load %arg1[%c0, %c0_0, %c0_1] : memref<1x16x256xf32, #tpu.memory_space<vmem>>, vector<1x16x256xf32>
    %1 = vector.shape_cast %0 : vector<1x16x256xf32> to vector<16x256xf32>
    %c0_2 = arith.constant 0 : index
    %c0_3 = arith.constant 0 : index
    %2 = vector.load %arg2[%c0_2, %c0_3] : memref<256x32xf32, #tpu.memory_space<vmem>>, vector<256x32xf32>
    %cst = arith.constant dense<0.000000e+00> : vector<16x32xf32>
    %3 = tpu.matmul %1, %2, %cst {dimension_numbers = #tpu.dot_dimension_numbers<[1], [0], [0], [1], [0, 0, 1, 1], [], []>} : vector<16x256xf32>, vector<256x32xf32>, vector<16x32xf32> -> vector<16x32xf32>
    %4 = vector.shape_cast %1 : vector<16x256xf32> to vector<16x16x16xf32>
    %cst_4 = arith.constant dense<0xFF800000> : vector<16x16xf32>
    %5 = vector.multi_reduction <maximumf>, %4, %cst_4 [2] : vector<16x16x16xf32> to vector<16x16xf32>
    %cst_5 = arith.constant dense<0xFF800000> : vector<16x16xf32>
    %6 = vector.multi_reduction <maximumf>, %4, %cst_5 [1] : vector<16x16x16xf32> to vector<16x16xf32>
    %7 = tpu.concatenate %5, %6 in 1 : vector<16x16xf32>, vector<16x16xf32> -> vector<16x32xf32>
    %c0_6 = arith.constant 0 : index
    %c0_7 = arith.constant 0 : index
    %8 = vector.load %arg5[%c0_6, %c0_7] : memref<4x16xf32, #tpu.memory_space<vmem>>, vector<4x16xf32>
    %cst_8 = arith.constant dense<0.000000e+00> : vector<4x32xf32>
    %9 = tpu.matmul %8, %3, %cst_8 {dimension_numbers = #tpu.dot_dimension_numbers<[1], [0], [0], [1], [0, 0, 1, 1], [], []>} : vector<4x16xf32>, vector<16x32xf32>, vector<4x32xf32> -> vector<4x32xf32>
    %cst_9 = arith.constant 0.000000e+00 : f32
    %10 = vector.broadcast %cst_9 : f32 to vector<4x32xf32>
    %11 = arith.maximumf %9, %10 : vector<4x32xf32>
    %c0_10 = arith.constant 0 : index
    %c0_11 = arith.constant 0 : index
    %12 = vector.load %arg6[%c0_10, %c0_11] : memref<16x4xf32, #tpu.memory_space<vmem>>, vector<16x4xf32>
    %cst_12 = arith.constant dense<0.000000e+00> : vector<16x32xf32>
    %13 = tpu.matmul %12, %11, %cst_12 {dimension_numbers = #tpu.dot_dimension_numbers<[1], [0], [0], [1], [0, 0, 1, 1], [], []>} : vector<16x4xf32>, vector<4x32xf32>, vector<16x32xf32> -> vector<16x32xf32>
    %c0_13 = arith.constant 0 : index
    %c0_14 = arith.constant 0 : index
    %14 = vector.load %arg5[%c0_13, %c0_14] : memref<4x16xf32, #tpu.memory_space<vmem>>, vector<4x16xf32>
    %cst_15 = arith.constant dense<0.000000e+00> : vector<4x32xf32>
    %15 = tpu.matmul %14, %7, %cst_15 {dimension_numbers = #tpu.dot_dimension_numbers<[1], [0], [0], [1], [0, 0, 1, 1], [], []>} : vector<4x16xf32>, vector<16x32xf32>, vector<4x32xf32> -> vector<4x32xf32>
    %cst_16 = arith.constant 0.000000e+00 : f32
    %16 = vector.broadcast %cst_16 : f32 to vector<4x32xf32>
    %17 = arith.maximumf %15, %16 : vector<4x32xf32>
    %c0_17 = arith.constant 0 : index
    %c0_18 = arith.constant 0 : index
    %18 = vector.load %arg6[%c0_17, %c0_18] : memref<16x4xf32, #tpu.memory_space<vmem>>, vector<16x4xf32>
    %cst_19 = arith.constant dense<0.000000e+00> : vector<16x32xf32>
    %19 = tpu.matmul %18, %17, %cst_19 {dimension_numbers = #tpu.dot_dimension_numbers<[1], [0], [0], [1], [0, 0, 1, 1], [], []>} : vector<16x4xf32>, vector<4x32xf32>, vector<16x32xf32> -> vector<16x32xf32>
    %20 = arith.addf %13, %19 : vector<16x32xf32>
    %21 = arith.negf %20 : vector<16x32xf32>
    %22 = math.exp %21 : vector<16x32xf32>
    %cst_20 = arith.constant 1.000000e+00 : f32
    %23 = vector.broadcast %cst_20 : f32 to vector<16x32xf32>
    %24 = arith.addf %23, %22 : vector<16x32xf32>
    %25 = arith.divf %23, %24 : vector<16x32xf32>
    %c0_21 = arith.constant 0 : index
    %c0_22 = arith.constant 0 : index
    %26 = vector.load %arg7[%c0_21, %c0_22] : memref<8x16xf32, #tpu.memory_space<vmem>>, vector<8x16xf32>
    %cst_23 = arith.constant dense<0.000000e+00> : vector<8x32xf32>
    %27 = tpu.matmul %26, %25, %cst_23 {dimension_numbers = #tpu.dot_dimension_numbers<[1], [0], [0], [1], [0, 0, 1, 1], [], []>} : vector<8x16xf32>, vector<16x32xf32>, vector<8x32xf32> -> vector<8x32xf32>
    %c0_24 = arith.constant 0 : index
    %c0_25 = arith.constant 0 : index
    %28 = vector.load %arg8[%c0_24, %c0_25] : memref<8x1xf32, #tpu.memory_space<vmem>>, vector<8x1xf32>
    %29 = vector.broadcast %28 : vector<8x1xf32> to vector<8x32xf32>
    %30 = arith.addf %27, %29 : vector<8x32xf32>
    %cst_26 = arith.constant 2.000000e+00 : f32
    %31 = vector.broadcast %cst_26 : f32 to vector<8x32xf32>
    %32 = arith.addf %30, %31 : vector<8x32xf32>
    %cst_27 = arith.constant 0.000000e+00 : f32
    %cst_28 = arith.constant 6.000000e+00 : f32
    %33 = vector.broadcast %cst_27 : f32 to vector<8x32xf32>
    %34 = arith.maximumf %33, %32 : vector<8x32xf32>
    %35 = vector.broadcast %cst_28 : f32 to vector<8x32xf32>
    %36 = arith.minimumf %35, %34 : vector<8x32xf32>
    %cst_29 = arith.constant 2.500000e-01 : f32
    %37 = vector.broadcast %cst_29 : f32 to vector<8x32xf32>
    %38 = arith.mulf %36, %37 : vector<8x32xf32>
    %39 = arith.mulf %30, %38 : vector<8x32xf32>
    %c0_30 = arith.constant 0 : index
    %c0_31 = arith.constant 0 : index
    %40 = vector.load %arg9[%c0_30, %c0_31] : memref<16x8xf32, #tpu.memory_space<vmem>>, vector<16x8xf32>
    %41 = vector.extract_strided_slice %39 {offsets = [0, 0], sizes = [8, 16], strides = [1, 1]} : vector<8x32xf32> to vector<8x16xf32>
    %cst_32 = arith.constant dense<0.000000e+00> : vector<16x16xf32>
    %42 = tpu.matmul %40, %41, %cst_32 {dimension_numbers = #tpu.dot_dimension_numbers<[1], [0], [0], [1], [0, 0, 1, 1], [], []>} : vector<16x8xf32>, vector<8x16xf32>, vector<16x16xf32> -> vector<16x16xf32>
    %c0_33 = arith.constant 0 : index
    %c0_34 = arith.constant 0 : index
    %43 = vector.load %arg10[%c0_33, %c0_34] : memref<16x1xf32, #tpu.memory_space<vmem>>, vector<16x1xf32>
    %44 = vector.broadcast %43 : vector<16x1xf32> to vector<16x16xf32>
    %45 = arith.addf %42, %44 : vector<16x16xf32>
    %46 = arith.negf %45 : vector<16x16xf32>
    %47 = math.exp %46 : vector<16x16xf32>
    %cst_35 = arith.constant 1.000000e+00 : f32
    %48 = vector.broadcast %cst_35 : f32 to vector<16x16xf32>
    %49 = arith.addf %48, %47 : vector<16x16xf32>
    %50 = arith.divf %48, %49 : vector<16x16xf32>
    %c0_36 = arith.constant 0 : index
    %c0_37 = arith.constant 0 : index
    %51 = vector.load %arg11[%c0_36, %c0_37] : memref<16x8xf32, #tpu.memory_space<vmem>>, vector<16x8xf32>
    %52 = vector.extract_strided_slice %39 {offsets = [0, 16], sizes = [8, 16], strides = [1, 1]} : vector<8x32xf32> to vector<8x16xf32>
    %cst_38 = arith.constant dense<0.000000e+00> : vector<16x16xf32>
    %53 = tpu.matmul %51, %52, %cst_38 {dimension_numbers = #tpu.dot_dimension_numbers<[1], [0], [0], [1], [0, 0, 1, 1], [], []>} : vector<16x8xf32>, vector<8x16xf32>, vector<16x16xf32> -> vector<16x16xf32>
    %c0_39 = arith.constant 0 : index
    %c0_40 = arith.constant 0 : index
    %54 = vector.load %arg12[%c0_39, %c0_40] : memref<16x1xf32, #tpu.memory_space<vmem>>, vector<16x1xf32>
    %55 = vector.broadcast %54 : vector<16x1xf32> to vector<16x16xf32>
    %56 = arith.addf %53, %55 : vector<16x16xf32>
    %57 = arith.negf %56 : vector<16x16xf32>
    %58 = math.exp %57 : vector<16x16xf32>
    %cst_41 = arith.constant 1.000000e+00 : f32
    %59 = vector.broadcast %cst_41 : f32 to vector<16x16xf32>
    %60 = arith.addf %59, %58 : vector<16x16xf32>
    %61 = arith.divf %59, %60 : vector<16x16xf32>
    %c0_42 = arith.constant 0 : index
    %c0_43 = arith.constant 0 : index
    %62 = vector.load %arg3[%c0_42, %c0_43] : memref<16x256xf32, #tpu.memory_space<vmem>>, vector<16x256xf32>
    %cst_44 = arith.constant dense<0.000000e+00> : vector<16x256xf32>
    %63 = tpu.matmul %50, %62, %cst_44 {dimension_numbers = #tpu.dot_dimension_numbers<[1], [0], [0], [1], [0, 0, 1, 1], [], []>} : vector<16x16xf32>, vector<16x256xf32>, vector<16x256xf32> -> vector<16x256xf32>
    %c0_45 = arith.constant 0 : index
    %c0_46 = arith.constant 0 : index
    %64 = vector.load %arg4[%c0_45, %c0_46] : memref<16x256xf32, #tpu.memory_space<vmem>>, vector<16x256xf32>
    %cst_47 = arith.constant dense<0.000000e+00> : vector<16x256xf32>
    %65 = tpu.matmul %61, %64, %cst_47 {dimension_numbers = #tpu.dot_dimension_numbers<[1], [0], [0], [1], [0, 0, 1, 1], [], []>} : vector<16x16xf32>, vector<16x256xf32>, vector<16x256xf32> -> vector<16x256xf32>
    %66 = arith.mulf %63, %65 : vector<16x256xf32>
    %c0_48 = arith.constant 0 : index
    %c0_49 = arith.constant 0 : index
    %c0_50 = arith.constant 0 : index
    %67 = vector.load %arg1[%c0_48, %c0_49, %c0_50] : memref<1x16x256xf32, #tpu.memory_space<vmem>>, vector<1x16x256xf32>
    %68 = vector.shape_cast %67 : vector<1x16x256xf32> to vector<16x256xf32>
    %69 = arith.mulf %68, %66 : vector<16x256xf32>
    %c0_51 = arith.constant 0 : index
    %c0_52 = arith.constant 0 : index
    %c0_53 = arith.constant 0 : index
    %70 = vector.load %arg13[%c0_51, %c0_52, %c0_53] : memref<1x16x256xf32, #tpu.memory_space<vmem>>, vector<1x16x256xf32>
    %71 = vector.shape_cast %70 : vector<1x16x256xf32> to vector<16x256xf32>
    %72 = vector.shape_cast %69 : vector<16x256xf32> to vector<1x16x256xf32>
    tpu.vector_store %arg13[%c0_51, %c0_52, %c0_53], %72 {strides = array<i32>} : memref<1x16x256xf32, #tpu.memory_space<vmem>>, vector<1x16x256xf32>,
    return
  }
  func.func @transform_0(%arg0: i32) -> (i32, i32, i32) {
    %c0_i32 = arith.constant 0 : i32
    %c0_i32_0 = arith.constant 0 : i32
    %c0_i32_1 = arith.constant 0 : i32
    return %arg0, %c0_i32, %c0_i32_0 : i32, i32, i32
  }
  func.func @transform_1(%arg0: i32) -> (i32, i32) {
    %c0_i32 = arith.constant 0 : i32
    %c0_i32_0 = arith.constant 0 : i32
    %c0_i32_1 = arith.constant 0 : i32
    return %c0_i32, %c0_i32_0 : i32, i32
  }
  func.func @transform_2(%arg0: i32) -> (i32, i32) {
    %c0_i32 = arith.constant 0 : i32
    %c0_i32_0 = arith.constant 0 : i32
    %c0_i32_1 = arith.constant 0 : i32
    return %c0_i32, %c0_i32_0 : i32, i32
  }
  func.func @transform_3(%arg0: i32) -> (i32, i32) {
    %c0_i32 = arith.constant 0 : i32
    %c0_i32_0 = arith.constant 0 : i32
    %c0_i32_1 = arith.constant 0 : i32
    return %c0_i32, %c0_i32_0 : i32, i32
  }
  func.func @transform_4(%arg0: i32) -> (i32, i32) {
    %c0_i32 = arith.constant 0 : i32
    %c0_i32_0 = arith.constant 0 : i32
    %c0_i32_1 = arith.constant 0 : i32
    return %c0_i32, %c0_i32_0 : i32, i32
  }
  func.func @transform_5(%arg0: i32) -> (i32, i32) {
    %c0_i32 = arith.constant 0 : i32
    %c0_i32_0 = arith.constant 0 : i32
    %c0_i32_1 = arith.constant 0 : i32
    return %c0_i32, %c0_i32_0 : i32, i32
  }
  func.func @transform_6(%arg0: i32) -> (i32, i32) {
    %c0_i32 = arith.constant 0 : i32
    %c0_i32_0 = arith.constant 0 : i32
    %c0_i32_1 = arith.constant 0 : i32
    return %c0_i32, %c0_i32_0 : i32, i32
  }
  func.func @transform_7(%arg0: i32) -> (i32, i32) {
    %c0_i32 = arith.constant 0 : i32
    %c0_i32_0 = arith.constant 0 : i32
    %c0_i32_1 = arith.constant 0 : i32
    return %c0_i32, %c0_i32_0 : i32, i32
  }
  func.func @transform_8(%arg0: i32) -> (i32, i32) {
    %c0_i32 = arith.constant 0 : i32
    %c0_i32_0 = arith.constant 0 : i32
    %c0_i32_1 = arith.constant 0 : i32
    return %c0_i32, %c0_i32_0 : i32, i32
  }
  func.func @transform_9(%arg0: i32) -> (i32, i32) {
    %c0_i32 = arith.constant 0 : i32
    %c0_i32_0 = arith.constant 0 : i32
    %c0_i32_1 = arith.constant 0 : i32
    return %c0_i32, %c0_i32_0 : i32, i32
  }
  func.func @transform_10(%arg0: i32) -> (i32, i32) {
    %c0_i32 = arith.constant 0 : i32
    %c0_i32_0 = arith.constant 0 : i32
    %c0_i32_1 = arith.constant 0 : i32
    return %c0_i32, %c0_i32_0 : i32, i32
  }
  func.func @transform_11(%arg0: i32) -> (i32, i32) {
    %c0_i32 = arith.constant 0 : i32
    %c0_i32_0 = arith.constant 0 : i32
    %c0_i32_1 = arith.constant 0 : i32
    return %c0_i32, %c0_i32_0 : i32, i32
  }
  func.func @transform_12(%arg0: i32) -> (i32, i32, i32) {
    %c0_i32 = arith.constant 0 : i32
    %c0_i32_0 = arith.constant 0 : i32
    %c0_i32_1 = arith.constant 0 : i32
    return %arg0, %c0_i32, %c0_i32_0 : i32, i32, i32
  }
}

</mosaic_0001>

<bundles_post_ra>
// kernel: tpu_custom_call.1
= control target key start
LH: loop header
LB: loop body
LE: loop exit
PB: predicated region body
PF: predicated region fallthrough
CT: control target
= control target key end

     0   :  { %s3704_s0 = inlined_call_operand.vmem [shape: f32[2,16,256], index: 0, kind: input, shape index: {}]   ;;  %s3705_s1 = inlined_call_operand.vmem [shape: f32[256,32], index: 1, kind: input, shape index: {}]   ;;  %s3706_s2 = inlined_call_operand.vmem [shape: f32[16,256], index: 2, kind: input, shape index: {}]   ;;  %s3707_s3 = inlined_call_operand.vmem [shape: f32[16,256], index: 3, kind: input, shape index: {}]   ;;  %s3708_s4 = inlined_call_operand.vmem [shape: f32[4,16], index: 4, kind: input, shape index: {}]   ;;  %s3709_s5 = inlined_call_operand.vmem [shape: f32[16,4], index: 5, kind: input, shape index: {}]   ;;  %s3710_s6 = inlined_call_operand.vmem [shape: f32[8,16], index: 6, kind: input, shape index: {}]   ;;  %s3711_s7 = inlined_call_operand.vmem [shape: f32[8,1], index: 7, kind: input, shape index: {}]   ;;  %s3712_s8 = inlined_call_operand.vmem [shape: f32[16,8], index: 8, kind: input, shape index: {}]   ;;  %s3713_s9 = inlined_call_operand.vmem [shape: f32[16,1], index: 9, kind: input, shape index: {}]   ;;  %s3714_s10 = inlined_call_operand.vmem [shape: f32[16,8], index: 10, kind: input, shape index: {}]   ;;  %s3715_s11 = inlined_call_operand.vmem [shape: f32[16,1], index: 11, kind: input, shape index: {}]   ;;  %s3716_s12 = inlined_call_operand.hbm [shape: f32[2,16,256], index: 12, kind: output, shape index: {}]  }
   0x1   :  { %3735 = sst [smem:[#allocation9_spill]] %s3704_s0 }
   0x2   :  { %17 = vsyncpa [#allocation3], 0 }
   0x3   :  { %19 = vsyncpa [#allocation3 + $0x1], 0  ;;  %s2859_s21 = smov 0   ;;  %s2861_s22 = smov 0  }
   0x4   :  { %s2863_s23 = smov 0   ;;  %s2865_s24 = smov 0  }
   0x5 LB: > { %3736 = sst [smem:[#allocation5_spill]] %s2774_s23  ;;  %s2880_s25 = sadd.s32 4294967295, %s2778_s24   ;;  %s2778_s24 = sphi %s2865_s24, %s3751_s24   ;;  %s2774_s23 = sphi %s2863_s23, %s3753_s23   ;;  %s2770_s22 = sphi %s2861_s22, %s3755_s22   ;;  %s2766_s21 = sphi %s2859_s21, %s3754_s21  }
   0x6   : > { %s2495_s26 = sadd.s32 4294967294, %s2778_s24   ;;  %s2884_s27 = sadd.s32 1, %s2778_s24  }
   0x7   : > { %3737 = sst [smem:[#allocation6_spill]] %s2884_s27  ;;  %s289_s28 = sadd.s32 1, %s2774_s23 }
   0x8   : > { %s286_s29 = ssub.s32 %s2778_s24, %s2884_s27  ;;  %p299_p0 = scmp.ne.s32.totalorder %s2774_s23, %s2770_s22 }
   0x9   : > { %p287_p1 = scmp.eq.s32.totalorder %s286_s29, 0  ;;  %p300_p2 = scmp.eq.s32.totalorder %s2880_s25, 1 }
   0xa   : > { %p305_p3 = scmp.ne.s32.totalorder %s2770_s22, %s2766_s21  ;;  %p306_p4 = scmp.eq.s32.totalorder %s2495_s26, 1 }
   0xb   : > { %s2895_s30 = scalar_select %p287_p1, %s2774_s23, %s289_s28  }
   0xc   : > { %p2897_p5 = por %p300_p2, %p299_p0  ;;  %p2901_p6 = por %p306_p4, %p305_p3 }
   0xd   : > { %3738 = sst [smem:[#allocation7_spill]] %s2895_s30  ;;  %p2498_p7 = scmp.ge.s32.totalorder %s2778_s24, 1 }
   0xe   : > { %s3740_s14 = scalar_select %p2901_p6, 1, 0 }
   0xf   : > { %p365_p8 = scmp.lt.s32.totalorder %s2778_s24, 3 }
  0x10   : > { %3741 = sst [smem:[#allocation8_spill]] %s3740_s14 }
  0x11   : > { %p366_p9 = pnand %p2498_p7, %p365_p8 }
  0x12   : > { %p407_p10 = scmp.lt.s32.totalorder (!%p366_p9), %s2880_s25, 1  ;;  %s3742_s0 = sld [smem:[#allocation9_spill]] (!%p366_p9) }
  0x13   : > { %369 = sbr.rel (%p366_p9) target bundleno = 1595 (0x63b), region = 68  ;;  %s3724_s30 = smov (!%p366_p9), 112  }
  0x14   : > { %s3720_s20 = smov (!%p366_p9), 64   ;;  %s3728_s26 = smov (!%p366_p9), 96  }
  0x15   : > { %s3722_s23 = smov (!%p366_p9), 32   ;;  %s3744_s19 = smov (!%p366_p9), 64  }
  0x16   : > { %s3747_s18 = smov (!%p366_p9), 96   ;;  %s3748_s27 = smov (!%p366_p9), 112  }
  0x17   : > { %s3749_s14 = smov (!%p366_p9), 48   ;;  %s404_s29 = sand.u32 (!%p366_p9), 1, %s2770_s22  }
  0x18   : > { %v447_v0 = vld [vmem:[%s3705_s1 + $0xf8] sm:$0xff]  ;;  %s408_s17 = scalar_select %p407_p10, %s2880_s25, 1  ;;  %v446_v2 = vld [vmem:[%s3705_s1 + $0xf0] sm:$0xff]  ;;  %v445_v4 = vld [vmem:[%s3705_s1 + $0xe8] sm:$0xff]  ;;  %v2787_v38 = vmov 1983009808   ;;  %v616_v40 = vlaneseq }
  0x19   : > { %2532 = vmatprep.subr.mxu0 %v447_v0  ;;  %v431_v1 = vld [vmem:[%s3705_s1 + $0x78] sm:$0xff]  ;;  %v430_v3 = vld [vmem:[%s3705_s1 + $0x70] sm:$0xff]  ;;  %v429_v7 = vld [vmem:[%s3705_s1 + $0x68] sm:$0xff]  ;;  %v614_v39 = vunpack.c.l.s4 %v2787_v38  ;;  %v2788_v46 = vmov 1934713408   ;;  %vm1155_vm0 = vcmask 130048  }
  0x1a   : > { %2533 = vmatpush3.msra.mxu0 %v431_v1  ;;  %s2530_s28 = sshll.u32 %s408_s17, 5  ;;  %s3718_s17 = smov 80   ;;  %v444_v8 = vld [vmem:[%s3705_s1 + $0xe0] sm:$0xff]  ;;  %v443_v10 = vld [vmem:[%s3705_s1 + $0xd8] sm:$0xff]  ;;  %v442_v12 = vld [vmem:[%s3705_s1 + $0xd0] sm:$0xff]  ;;  %v3091_v44 = vshrl.u32 %v616_v40, 7  ;;  %v678_v47 = vunpack.c.l.s4 %v2788_v46 }
  0x1b   : > { %2534 = vmatprep.subr.mxu0 %v446_v2  ;;  %s2924_s16 = scalar_lea.vmem %s3742_s0, %s2530_s28  ;;  %v428_v9 = vld [vmem:[%s3705_s1 + $0x60] sm:$0xff]  ;;  %v427_v11 = vld [vmem:[%s3705_s1 + $0x58] sm:$0xff]  ;;  %v426_v13 = vld [vmem:[%s3705_s1 + $0x50] sm:$0xff]  ;;  %v615_v43 = vunpack.c.0.s8 %v614_v39  ;;  %vm1544_vm1 = vcmask 1041409   ;;  %vm1546_vm2 = vcmask 1042434   ;;  %vm1548_vm3 = vcmask 1043459  }
  0x1c   : > { %2535 = vmatpush3.msra.mxu0 %v430_v3  ;;  %v2930_v5 = vld [vmem:[%s2924_s16 + $0x10] sm:$0xff]  ;;  %v2937_v6 = vld [vmem:[%s2924_s16 + $0x8] sm:$0xff]  ;;  %v2976_v16 = vld [vmem:[%s2924_s16 + $0x18] sm:$0xff]  ;;  %v679_v54 = vunpack.c.0.s8 %v678_v47  ;;  %vm1550_vm4 = vcmask 1044484   ;;  %vm1552_vm5 = vcmask 1045509   ;;  %vm1554_vm6 = vcmask 1046534  }
  0x1d   : > { %2536 = vmatprep.subr.mxu0 %v445_v4  ;;  %539 = vrot.lane.b32.xlu1 %v2930_v5, %s3718_s17  ;;  %v441_v14 = vld [vmem:[%s3705_s1 + $0xc8] sm:$0xff]  ;;  %v440_v17 = vld [vmem:[%s3705_s1 + $0xc0] sm:$0xff]  ;;  %v439_v19 = vld [vmem:[%s3705_s1 + $0xb8] sm:$0xff]  ;;  %s3745_s17 = smov 16   ;;  %v3100_v50 = vsub.s32 %v615_v43, %v3091_v44  ;;  %vm1556_vm7 = vcmask 1047559   ;;  %vm2790_vm8 = vmmov 0  }
  0x1e   : > { %527 = vrot.lane.b32.xlu0 %v2930_v5, %s3724_s30  ;;  %2537 = vmatpush3.msra.mxu0 %v429_v7  ;;  %v425_v15 = vld [vmem:[%s3705_s1 + $0x48] sm:$0xff]  ;;  %v424_v18 = vld [vmem:[%s3705_s1 + $0x40] sm:$0xff]  ;;  %v423_v20 = vld [vmem:[%s3705_s1 + $0x38] sm:$0xff]  ;;  %v3117_v62 = vsub.s32 %v679_v54, %v3091_v44  ;;  %vm1407_vm9 = vcmask 130112   ;;  %vm1753_vm10 = vcmask 31744   ;;  %vm1760_vm11 = vcmask 1043456  }
  0x1f   : > { %512 = vmatprep.mubr.f32.mxu0 %v2937_v6  ;;  %2538 = vmatprep.subr.mxu0 %v444_v8  ;;  %v438_v21 = vld [vmem:[%s3705_s1 + $0xb0] sm:$0xff]  ;;  %v437_v23 = vld [vmem:[%s3705_s1 + $0xa8] sm:$0xff]  ;;  %v436_v25 = vld [vmem:[%s3705_s1 + $0xa0] sm:$0xff]  ;;  %vm2028_vm12 = vcmask 64512   ;;  %s2499_s15 = sshll.u32 %s404_s29, 5 }
  0x20   : > { %2539 = vmatpush3.msra.mxu0 %v428_v9  ;;  %v422_v22 = vld [vmem:[%s3705_s1 + $0x30] sm:$0xff]  ;;  %v421_v24 = vld [vmem:[%s3705_s1 + $0x28] sm:$0xff]  ;;  %v420_v26 = vld [vmem:[%s3705_s1 + $0x20] sm:$0xff]  ;;  %s406_s0 = scalar_lea.vmem [#allocation2], %s2499_s15 }
  0x21   : > { %545 = vrot.lane.b32.xlu1 %v2930_v5, %s3720_s20  ;;  %2540 = vmatprep.subr.mxu0 %v443_v10  ;;  %s3730_s20 = smov 48   ;;  %v435_v27 = vld [vmem:[%s3705_s1 + $0x98] sm:$0xff]  ;;  %v3031_v29 = vld [vmem:[%s2924_s16] sm:$0xff]  ;;  %v434_v30 = vld [vmem:[%s3705_s1 + $0x90] sm:$0xff] }
  0x22   : > { %533 = vrot.lane.b32.xlu0 %v2930_v5, %s3728_s26  ;;  %2541 = vmatpush3.msra.mxu0 %v427_v11  ;;  %v419_v28 = vld [vmem:[%s3705_s1 + $0x18] sm:$0xff]  ;;  %v418_v31 = vld [vmem:[%s3705_s1 + $0x10] sm:$0xff]  ;;  %v433_v32 = vld [vmem:[%s3705_s1 + $0x88] sm:$0xff] }
  0x23   : > { %2542 = vmatprep.subr.mxu0 %v442_v12  ;;  %v417_v33 = vld [vmem:[%s3705_s1 + $0x8] sm:$0xff]  ;;  %v432_v34 = vld [vmem:[%s3705_s1 + $0x80] sm:$0xff] }
  0x24   : > { %2543 = vmatpush3.msra.mxu0 %v426_v13  ;;  %v416_v35 = vld [vmem:[%s3705_s1] sm:$0xff] }
  0x25   : > { %557 = vrot.lane.b32.xlu1 %v2930_v5, %s3722_s23  ;;  %2544 = vmatprep.subr.mxu0 %v441_v14  ;;  %s3726_s23 = smov 16  }
  0x26   : > { %551 = vrot.lane.b32.xlu0 %v2930_v5, %s3730_s20  ;;  %2545 = vmatpush3.msra.mxu0 %v425_v15 }
  0x27   : > { %2546 = vmatprep.subr.mxu0 %v440_v17 }
  0x28   : > { %2547 = vmatpush3.msra.mxu0 %v424_v18 }
  0x29   : > { %571 = vrot.lane.b32.xlu1 %v2976_v16, %s3724_s30  ;;  %2548 = vmatprep.subr.mxu0 %v439_v19  ;;  %s3743_s30 = smov 80  }
  0x2a   : > { %563 = vrot.lane.b32.xlu0 %v2930_v5, %s3726_s23  ;;  %2549 = vmatpush3.msra.mxu0 %v423_v20  ;;  %s2792_s23 = smov [#allocation2]  }
  0x2b   : > { %2550 = vmatprep.subr.mxu0 %v438_v21 }
  0x2c   : > { %2551 = vmatpush3.msra.mxu0 %v422_v22 }
  0x2d   : > { %583 = vrot.lane.b32.xlu1 %v2976_v16, %s3743_s30  ;;  %2552 = vmatprep.subr.mxu0 %v437_v23 }
  0x2e   : > { %577 = vrot.lane.b32.xlu0 %v2976_v16, %s3728_s26  ;;  %2553 = vmatpush3.msra.mxu0 %v421_v24  ;;  %s2722_s26 = sshll.u32 %s2792_s23, 4  ;;  %s2723_s26 = int_to_ptr.vmem [resolvable:$false] %s2722_s26 }
  0x2f   : > { %2554 = vmatprep.subr.mxu0 %v436_v25  ;;  %s2724_s28 = scalar_lea.vmem %s2723_s26, 1024 }
  0x30   : > { %2555 = vmatpush3.msra.mxu0 %v420_v26 }
  0x31   : > { %595 = vrot.lane.b32.xlu1 %v2976_v16, %s3730_s20  ;;  %s3746_s20 = smov 32   ;;  %2556 = vmatprep.subr.mxu0 %v435_v27 }
  0x32   : > { %589 = vrot.lane.b32.xlu0 %v2976_v16, %s3744_s19  ;;  %2557 = vmatpush3.msra.mxu0 %v419_v28 }
  0x33   : > { %2558 = vmatprep.subr.mxu0 %v434_v30 }
  0x34   : > { %2559 = vmatpush3.msra.mxu0 %v418_v31 }
  0x35   : > { %607 = vrot.lane.b32.xlu1 %v2976_v16, %s3745_s17  ;;  %2560 = vmatprep.subr.mxu0 %v433_v32 }
  0x36   : > { %601 = vrot.lane.b32.xlu0 %v2976_v16, %s3746_s20  ;;  %2561 = vmatpush3.msra.mxu0 %v417_v33 }
  0x37   : > { %2562 = vmatprep.subr.mxu0 %v432_v34 }
  0x38   : > { %2563 = vmatpush3.msra.mxu0 %v416_v35 }
  0x39   : > { %531 = vrot.lane.b32.xlu1 %v3031_v29, %s3747_s18  ;;  %513 = vmatmul.mubr.f32.vlgmr.msra.gmra.mxu0 %v3031_v29 }
  0x3a   : > { %525 = vrot.lane.b32.xlu0 %v3031_v29, %s3748_s27  ;;  %517 = vmatprep.mubr.f32.mxu0 %v2976_v16 }
  0x3d   : > { %543 = vrot.lane.b32.xlu1 %v3031_v29, %s3744_s19  ;;  %518 = vmatmul.mubr.f32.gmra.mxu0 %v2930_v5 }
  0x3e   : > { %537 = vrot.lane.b32.xlu0 %v3031_v29, %s3743_s30 }
  0x41   : > { %555 = vrot.lane.b32.xlu1 %v3031_v29, %s3746_s20 }
  0x42   : > { %549 = vrot.lane.b32.xlu0 %v3031_v29, %s3749_s14 }
  0x45   : > { %569 = vrot.lane.b32.xlu1 %v2937_v6, %s3748_s27 }
  0x46   : > { %561 = vrot.lane.b32.xlu0 %v3031_v29, %s3745_s17 }
  0x49   : > { %581 = vrot.lane.b32.xlu1 %v2937_v6, %s3743_s30 }
  0x4a   : > { %575 = vrot.lane.b32.xlu0 %v2937_v6, %s3747_s18 }
  0x4d   : > { %593 = vrot.lane.b32.xlu1 %v2937_v6, %s3749_s14  ;;  %s2433_s14 = sshll.u32 %s406_s0, 4  ;;  %s3655_s14 = int_to_ptr.vmem [resolvable:$true] %s2433_s14 }
  0x4e   : > { %587 = vrot.lane.b32.xlu0 %v2937_v6, %s3744_s19  ;;  %s3663_s19 = scalar_lea.sflag [#allocation3], %s404_s29  ;;  %s2718_s18 = scalar_lea.vmem %s3655_s14, 512 }
  0x4f   : > { %p2719_p11 = scmp.ne.s32.totalorder %s3655_s14, %s2718_s18  ;;  %p2725_p0 = scmp.lt.s32.totalorder %s3655_s14, %s2723_s26 }
  0x50   : > { %p2726_p1 = scmp.lt.s32.totalorder %s2724_s28, %s2718_s18 }
  0x51   : > { %605 = vrot.lane.b32.xlu1 %v2937_v6, %s3745_s17  ;;  %p2720_p12 = pnand %p2719_p11, %p2897_p5 }
  0x52   : > { %599 = vrot.lane.b32.xlu0 %v2937_v6, %s3746_s20  ;;  %p2727_p2 = por %p2726_p1, %p2725_p0 }
  0x53   : > { %p2721_p13 = pneg %p2720_p12 }
  0x55   : > { %p2728_p3 = pnand %p2727_p2, %p2721_p13 }
  0x8f   : > { %v3082_v36 = vpop.permute.xlu1 %539 }
  0x90   : > { %v3084_v37 = vpop.permute.xlu0 %527 }
  0x91   : > { %v899_v51 = vcombine.low %v3084_v37, %v3082_v36 }
  0x93   : > { %v3086_v41 = vpop.permute.xlu1 %545  ;;  %v907_v57 = vrot.slane %v899_v51, %v3100_v50 }
  0x94   : > { %v3088_v42 = vpop.permute.xlu0 %533 }
  0x95   : > { %v883_v45 = vcombine.low %v2930_v5, %v3088_v42 }
  0x97   : > { %v3095_v48 = vpop.permute.xlu1 %557  ;;  %v891_v52 = vrot.slane %v883_v45, %v3100_v50 }
  0x98   : > { %v3097_v49 = vpop.permute.xlu0 %551  ;;  %v915_v53 = vcombine.low %v3086_v41, %v3095_v48 }
  0x99   : > { %v947_v59 = vcombine.low %v891_v52, %v907_v57  ;;  %v948_v27 = vcombine.high %v891_v52, %v907_v57 }
  0x9a   : > { %v923_v60 = vrot.slane %v915_v53, %v3100_v50 }
  0x9b   : > { %v3107_v55 = vpop.permute.xlu1 %571  ;;  %v955_v4 = vrot.slane %v947_v59, %v3117_v62  ;;  %v3164_v46 = vrot.slane %v948_v27, %v3117_v62 }
  0x9c   : > { %v3109_v56 = vpop.permute.xlu0 %563 }
  0x9d   : > { %v931_v58 = vcombine.low %v3097_v49, %v3109_v56 }
  0x9f   : > { %v939_v61 = vrot.slane %v931_v58, %v3100_v50  ;;  %v3119_v63 = vpop.permute.xlu1 %583 }
  0xa0   : > { %v3121_v0 = vpop.permute.xlu0 %577  ;;  %v1035_v2 = vcombine.low %v3107_v55, %v3119_v63 }
  0xa1   : > { %v979_v1 = vcombine.low %v923_v60, %v939_v61  ;;  %v1019_v3 = vcombine.low %v2976_v16, %v3121_v0  ;;  %v980_v20 = vcombine.high %v923_v60, %v939_v61 }
  0xa2   : > { %v1043_v11 = vrot.slane %v1035_v2, %v3100_v50 }
  0xa3   : > { %v987_v7 = vrot.slane %v979_v1, %v3117_v62  ;;  %v3129_v8 = vpop.permute.xlu1 %595  ;;  %v1027_v12 = vrot.slane %v1019_v3, %v3100_v50  ;;  %v3154_v34 = vrot.slane %v980_v20, %v3117_v62 }
  0xa4   : > { %v3131_v9 = vpop.permute.xlu0 %589 }
  0xa5   : > { %v1011_v10 = vcombine.low %v955_v4, %v987_v7  ;;  %v1012_v14 = vcombine.high %v955_v4, %v987_v7  ;;  %v1083_v21 = vcombine.low %v1027_v12, %v1043_v11  ;;  %v1084_v31 = vcombine.high %v1027_v12, %v1043_v11 }
  0xa6   : > { %v1013_v54 = vcombine.low %v3164_v46, %v3154_v34 }
  0xa7   : > { %v1204_v13 = vsel %vm1155_vm0, %v1011_v10, -inf  ;;  %v3136_v15 = vpop.permute.xlu1 %607  ;;  %v1210_v24 = vsel %vm1155_vm0, %v1012_v14, -inf  ;;  %v1091_v32 = vrot.slane %v1083_v21, %v3117_v62  ;;  %v3167_v47 = vrot.slane %v1084_v31, %v3117_v62 }
  0xa8   : > { %v3138_v17 = vpop.permute.xlu0 %601  ;;  %1205 = vmax.xlane.f32.xlu0 %v1204_v13  ;;  %v1067_v18 = vcombine.low %v3129_v8, %v3136_v15  ;;  %v3186_v7 = vsel %vm1155_vm0, %v1013_v54, -inf }
  0xa9   : > { %v1051_v19 = vcombine.low %v3131_v9, %v3138_v17 }
  0xaa   : > { %v1075_v22 = vrot.slane %v1067_v18, %v3100_v50 }
  0xab   : > { %v1059_v23 = vrot.slane %v1051_v19, %v3100_v50  ;;  %v3147_v25 = vpop.permute.xlu1 %531 }
  0xac   : > { %1211 = vmax.xlane.f32.xlu0 %v1210_v24  ;;  %v3149_v26 = vpop.permute.xlu0 %525  ;;  %v611_v1 = vcombine.low %v3031_v29, %v3147_v25 }
  0xad   : > { %v1115_v28 = vcombine.low %v1059_v23, %v1075_v22  ;;  %v1116_v30 = vcombine.high %v1059_v23, %v1075_v22 }
  0xae   : > { %v619_v20 = vrot.slane %v611_v1, %v3100_v50 }
  0xaf   : > { %v1123_v33 = vrot.slane %v1115_v28, %v3117_v62  ;;  %v3156_v35 = vpop.permute.xlu1 %543  ;;  %v3161_v39 = vrot.slane %v1116_v30, %v3117_v62 }
  0xb0   : > { %v3158_v38 = vpop.permute.xlu0 %537 }
  0xb1   : > { %v1147_v43 = vcombine.low %v1091_v32, %v1123_v33  ;;  %v1148_v45 = vcombine.high %v1091_v32, %v1123_v33  ;;  %v627_v51 = vcombine.low %v3149_v26, %v3158_v38  ;;  %v1149_v61 = vcombine.low %v3167_v47, %v3161_v39 }
  0xb3   : > { %v1207_v52 = vsel %vm1155_vm0, %v1147_v43, -inf  ;;  %v1213_v53 = vsel %vm1155_vm0, %v1148_v45, -inf  ;;  %v3175_v58 = vpop.permute.xlu1 %555  ;;  %v3189_v10 = vrot.slane %v627_v51, %v3100_v50  ;;  %v3195_v14 = vsel %vm1155_vm0, %v1149_v61, -inf }
  0xb4   : > { %v1308_v57 = vmax.f32 %v1204_v13, %v1207_v52  ;;  %1208 = vmax.xlane.f32.xlu1 %v1207_v52  ;;  %v1315_v59 = vmax.f32 %v1210_v24, %v1213_v53  ;;  %1214 = vmax.xlane.f32.xlu0 %v1213_v53  ;;  %v3177_v60 = vpop.permute.xlu0 %549  ;;  %v643_v4 = vcombine.low %v3156_v35, %v3175_v58 }
  0xb5   : > { %v675_v27 = vcombine.low %v619_v20, %v3189_v10  ;;  %v932_v51 = vcombine.high %v3097_v49, %v3109_v56  ;;  %v884_v49 = vcombine.high %v2930_v5, %v3088_v42  ;;  %v916_v56 = vcombine.high %v3086_v41, %v3095_v48 }
  0xb6   : > { %v1309_v2 = vrot.slane %v1308_v57, 4  ;;  %v1316_v3 = vrot.slane %v1315_v59, 4  ;;  %v651_v23 = vrot.slane %v643_v4, %v3100_v50 }
  0xb7   : > { %v3192_v13 = vpop.permute.xlu1 %569  ;;  %v683_v1 = vrot.slane %v675_v27, %v3117_v62 }
  0xb8   : > { %v1310_v11 = vmax.f32 %v1308_v57, %v1309_v2  ;;  %v1317_v12 = vmax.f32 %v1315_v59, %v1316_v3  ;;  %1217 = vmax.xlane.f32.xlu1 %v3186_v7  ;;  %v3197_v18 = vpop.permute.xlu0 %561  ;;  %1220 = vmax.xlane.f32.xlu0 %v3195_v14 }
  0xb9   : > { %v659_v19 = vcombine.low %v3177_v60, %v3197_v18 }
  0xba   : > { %v1311_v21 = vrot.slane %v1310_v11, 2  ;;  %v1318_v22 = vrot.slane %v1317_v12, 2 }
  0xbb   : > { %v667_v24 = vrot.slane %v659_v19, %v3100_v50  ;;  %v3206_v31 = vpop.permute.xlu1 %581 }
  0xbc   : > { %v1312_v28 = vmax.f32 %v1310_v11, %v1311_v21  ;;  %v1319_v30 = vmax.f32 %v1317_v12, %v1318_v22  ;;  %v3208_v32 = vpop.permute.xlu0 %575  ;;  %v763_v52 = vcombine.low %v3192_v13, %v3206_v31  ;;  %v900_v11 = vcombine.high %v3084_v37, %v3082_v36 }
  0xbd   : > { %v707_v33 = vcombine.low %v651_v23, %v667_v24  ;;  %v747_v53 = vcombine.low %v2937_v6, %v3208_v32  ;;  %v3238_v21 = vrot.slane %v932_v51, %v3100_v50  ;;  %v708_v5 = vcombine.high %v651_v23, %v667_v24 }
  0xbe   : > { %v1313_v43 = vrot.slane %v1312_v28, 1  ;;  %v1320_v45 = vrot.slane %v1319_v30, 1  ;;  %v3232_v12 = vrot.slane %v763_v52, %v3100_v50  ;;  %v3248_v36 = vrot.slane %v884_v49, %v3100_v50 }
  0xbf   : > { %v3216_v59 = vpop.permute.xlu1 %593  ;;  %v715_v2 = vrot.slane %v707_v33, %v3117_v62  ;;  %v3235_v19 = vrot.slane %v747_v53, %v3100_v50  ;;  %v3256_v23 = vrot.slane %v916_v56, %v3100_v50  ;;  %v676_v24 = vcombine.high %v619_v20, %v3189_v10 }
  0xc0   : > { %v1314_v54 = vmax.f32 %v1312_v28, %v1313_v43  ;;  %v1321_v57 = vmax.f32 %v1319_v30, %v1320_v45  ;;  %v3218_v61 = vpop.permute.xlu0 %587  ;;  %v3260_v28 = vrot.slane %v900_v11, %v3100_v50  ;;  %v1014_v52 = vcombine.high %v3164_v46, %v3154_v34 }
  0xc1   : > { %v739_v4 = vcombine.low %v683_v1, %v715_v2  ;;  %v740_v22 = vcombine.high %v683_v1, %v715_v2  ;;  %v811_v30 = vcombine.low %v3235_v19, %v3232_v12  ;;  %v995_v45 = vcombine.low %v3256_v23, %v3238_v21 }
  0xc2   : > { %v3227_v3 = vsel %vm1544_vm1, %v1321_v57, %v1314_v54  ;;  %v722_v10 = vrot.slane %v708_v5, %v3117_v62  ;;  %v963_v20 = vcombine.low %v3248_v36, %v3260_v28  ;;  %v1036_v53 = vcombine.high %v3107_v55, %v3119_v63 }
  0xc3   : > { %v3240_v42 = vpop.permute.xlu1 %605  ;;  %v3243_v41 = vsel %vm1155_vm0, %v739_v4, -inf  ;;  %v3269_v51 = vsel %vm1155_vm0, %v740_v22, -inf  ;;  %v1068_v57 = vcombine.high %v3129_v8, %v3136_v15  ;;  %v1052_v1 = vcombine.high %v3131_v9, %v3138_v17 }
  0xc4   : > { %v3245_v48 = vpop.permute.xlu0 %599  ;;  %v795_v37 = vcombine.low %v3216_v59, %v3240_v42  ;;  %1157 = vmax.xlane.f32.xlu1 %v3243_v41  ;;  %v690_v2 = vrot.slane %v676_v24, %v3117_v62  ;;  %v1020_v34 = vcombine.high %v2976_v16, %v3121_v0  ;;  %v819_v46 = vrot.slane %v811_v30, %v3117_v62 }
  0xc5   : > { %v779_v27 = vcombine.low %v3218_v61, %v3245_v48  ;;  %v660_v55 = vcombine.high %v3177_v60, %v3197_v18  ;;  %v3291_v63 = vsel %vm1155_vm0, %v1014_v52, -inf  ;;  %v1003_v8 = vrot.slane %v995_v45, %v3117_v62 }
  0xc6   : > { %v803_v33 = vrot.slane %v795_v37, %v3100_v50  ;;  %v741_v56 = vcombine.low %v690_v2, %v722_v10  ;;  %v3295_v9 = vrot.slane %v1036_v53, %v3100_v50  ;;  %v971_v16 = vrot.slane %v963_v20, %v3117_v62 }
  0xc7   : > { %v787_v43 = vrot.slane %v779_v27, %v3100_v50  ;;  %v1082_v0 = vrot.slane %v1068_v57, %v3100_v50  ;;  %v1066_v17 = vrot.slane %v1052_v1, %v3100_v50  ;;  %v628_v60 = vcombine.high %v3149_v26, %v3158_v38 }
  0xc8   : > { %1163 = vmax.xlane.f32.xlu1 %v3269_v51  ;;  %v644_v18 = vcombine.high %v3156_v35, %v3175_v58  ;;  %v1034_v4 = vrot.slane %v1020_v34, %v3100_v50  ;;  %v612_v37 = vcombine.high %v3031_v29, %v3147_v25  ;;  %v3312_v27 = vrot.slane %v660_v55, %v3100_v50 }
  0xc9   : > { %v843_v54 = vcombine.low %v787_v43, %v803_v33  ;;  %v844_v11 = vcombine.high %v787_v43, %v803_v33  ;;  %v3315_v24 = vsel %vm1155_vm0, %v741_v56, -inf  ;;  %v1015_v26 = vcombine.low %v971_v16, %v1003_v8 }
  0xca   : > { %v812_v35 = vcombine.high %v3235_v19, %v3232_v12  ;;  %v1131_v38 = vcombine.low %v1066_v17, %v1082_v0  ;;  %v3322_v58 = vrot.slane %v628_v60, %v3100_v50  ;;  %v3325_v29 = vrot.slane %v644_v18, %v3100_v50 }
  0xcb   : > { %v851_v49 = vrot.slane %v843_v54, %v3117_v62  ;;  %v1150_v25 = vcombine.high %v3167_v47, %v3161_v39  ;;  %v1099_v30 = vcombine.low %v1034_v4, %v3295_v9  ;;  %v858_v43 = vrot.slane %v844_v11, %v3117_v62 }
  0xcc   : > { %1223 = vmax.xlane.f32.xlu1 %v3291_v63  ;;  %v3335_v12 = vrot.slane %v612_v37, %v3100_v50  ;;  %v723_v19 = vcombine.low %v3325_v29, %v3312_v27  ;;  %v1228_v45 = vsel %vm1155_vm0, %v1015_v26, -inf  ;;  %v742_v52 = vcombine.high %v690_v2, %v722_v10 }
  0xcd   : > { %v875_v15 = vcombine.low %v819_v46, %v851_v49  ;;  %v876_v22 = vcombine.high %v819_v46, %v851_v49  ;;  %v826_v39 = vrot.slane %v812_v35, %v3117_v62  ;;  %v996_v47 = vcombine.high %v3256_v23, %v3238_v21 }
  0xce   : > { %v691_v20 = vcombine.low %v3335_v12, %v3322_v58  ;;  %v1225_v53 = vsel %vm1155_vm0, %v1150_v25, -inf  ;;  %v1139_v54 = vrot.slane %v1131_v38, %v3117_v62  ;;  %v1322_v57 = vmax.f32 %v3186_v7, %v3195_v14 }
  0xcf   : > { %v3307_v5 = vsel %vm1155_vm0, %v875_v15, -inf  ;;  %v3331_v33 = vsel %vm1155_vm0, %v876_v22, -inf  ;;  %v796_v1 = vcombine.high %v3216_v59, %v3240_v42  ;;  %v780_v10 = vcombine.high %v3218_v61, %v3245_v48 }
  0xd0   : > { %1160 = vmax.xlane.f32.xlu0 %v3307_v5  ;;  %1169 = vmax.xlane.f32.xlu1 %v3315_v24  ;;  %v877_v2 = vcombine.low %v826_v39, %v858_v43  ;;  %v3355_v34 = vsel %vm1155_vm0, %v742_v52, -inf  ;;  %v1016_v21 = vcombine.high %v971_v16, %v1003_v8  ;;  %v731_v23 = vrot.slane %v723_v19, %v3117_v62 }
  0xd1   : > { %v1107_v46 = vrot.slane %v1099_v30, %v3117_v62  ;;  %v1132_v49 = vcombine.high %v1066_v17, %v1082_v0  ;;  %v764_v7 = vcombine.high %v3192_v13, %v3206_v31  ;;  %v748_v14 = vcombine.high %v2937_v6, %v3208_v32 }
  0xd2   : > { %v964_v59 = vcombine.high %v3248_v36, %v3260_v28  ;;  %v1100_v61 = vcombine.high %v1034_v4, %v3295_v9  ;;  %v699_v42 = vrot.slane %v691_v20, %v3117_v62  ;;  %v1323_v55 = vrot.slane %v1322_v57, 4 }
  0xd3   : > { %v1151_v48 = vcombine.low %v1107_v46, %v1139_v54  ;;  %v3369_v56 = vrot.slane %v796_v1, %v3100_v50  ;;  %v3372_v8 = vrot.slane %v780_v10, %v3100_v50  ;;  %v1171_v13 = vsel %vm1155_vm0, %v877_v2, -inf }
  0xd4   : > { %1166 = vmax.xlane.f32.xlu0 %v3331_v33  ;;  %1229 = vmax.xlane.f32.xlu1 %v1228_v45  ;;  %v1234_v6 = vsel %vm1155_vm0, %v1016_v21, -inf  ;;  %v743_v31 = vcombine.low %v699_v42, %v731_v23  ;;  %v1010_v32 = vrot.slane %v996_v47, %v3117_v62  ;;  %v3378_v36 = vrot.slane %v764_v7, %v3100_v50 }
  0xd5   : > { %v3381_v28 = vrot.slane %v748_v14, %v3100_v50  ;;  %v1146_v9 = vrot.slane %v1132_v49, %v3117_v62  ;;  %v1231_v15 = vsel %vm1155_vm0, %v1151_v48, -inf  ;;  %v978_v16 = vrot.slane %v964_v59, %v3117_v62 }
  0xd6   : > { %v1152_v0 = vcombine.high %v1107_v46, %v1139_v54  ;;  %v1114_v17 = vrot.slane %v1100_v61, %v3117_v62  ;;  %v1324_v60 = vmax.f32 %v1322_v57, %v1323_v55  ;;  %v859_v18 = vcombine.low %v3372_v8, %v3369_v56 }
  0xd7   : > { %v1329_v4 = vmax.f32 %v3291_v63, %v1225_v53  ;;  %v878_v11 = vcombine.high %v826_v39, %v858_v43  ;;  %v3391_v50 = vsel %vm1155_vm0, %v743_v31, -inf  ;;  %v1017_v22 = vcombine.low %v978_v16, %v1010_v32 }
  0xd8   : > { %1226 = vmax.xlane.f32.xlu0 %v1225_v53  ;;  %1175 = vmax.xlane.f32.xlu1 %v3355_v34  ;;  %v827_v37 = vcombine.low %v3381_v28, %v3378_v36  ;;  %v1336_v26 = vmax.f32 %v1228_v45, %v1231_v15  ;;  %v1153_v35 = vcombine.low %v1114_v17, %v1146_v9  ;;  %v1237_v38 = vsel %vm1155_vm0, %v1152_v0, -inf }
  0xd9   : > { %v1325_v25 = vrot.slane %v1324_v60, 2  ;;  %v1330_v30 = vrot.slane %v1329_v4, 4  ;;  %v1177_v19 = vsel %vm1155_vm0, %v878_v11, -inf  ;;  %v3399_v63 = vrot.slane %v859_v18, %v3117_v62 }
  0xda   : > { %v724_v43 = vcombine.high %v3325_v29, %v3312_v27  ;;  %v1240_v52 = vsel %vm1155_vm0, %v1017_v22, -inf  ;;  %v744_v39 = vcombine.high %v699_v42, %v731_v23  ;;  %v1154_v47 = vcombine.high %v1114_v17, %v1146_v9 }
  0xdb   : > { %v1337_v20 = vrot.slane %v1336_v26, 4  ;;  %v1343_v45 = vmax.f32 %v1234_v6, %v1237_v38  ;;  %v835_v53 = vrot.slane %v827_v37, %v3117_v62  ;;  %v1243_v54 = vsel %vm1155_vm0, %v1153_v35, -inf }
  0xdc   : > { %1172 = vmax.xlane.f32.xlu0 %v1171_v13  ;;  %1235 = vmax.xlane.f32.xlu1 %v1234_v6  ;;  %v692_v57 = vcombine.high %v3335_v12, %v3322_v58  ;;  %v1252_v1 = vmax.f32 %v3243_v41, %v3307_v5  ;;  %v1018_v10 = vcombine.high %v978_v16, %v1010_v32  ;;  %v1186_v23 = vsel %vm1155_vm0, %v744_v39, -inf }
  0xdd   : > { %v1326_v27 = vmax.f32 %v1324_v60, %v1325_v25  ;;  %v1259_v29 = vmax.f32 %v3269_v51, %v3331_v33  ;;  %v1331_v2 = vmax.f32 %v1329_v4, %v1330_v30  ;;  %v879_v21 = vcombine.low %v835_v53, %v3399_v63 }
  0xde   : > { %v738_v46 = vrot.slane %v724_v43, %v3117_v62  ;;  %v1350_v49 = vmax.f32 %v1240_v52, %v1243_v54  ;;  %v3416_v7 = vsel %vm1155_vm0, %v1154_v47, -inf  ;;  %v860_v41 = vcombine.high %v3372_v8, %v3369_v56 }
  0xdf   : > { %v1266_v5 = vmax.f32 %v3315_v24, %v1171_v13  ;;  %v1338_v58 = vmax.f32 %v1336_v26, %v1337_v20  ;;  %v1344_v51 = vrot.slane %v1343_v45, 4  ;;  %v828_v33 = vcombine.high %v3381_v28, %v3378_v36 }
  0xe0   : > { %1232 = vmax.xlane.f32.xlu0 %v1231_v15  ;;  %1181 = vmax.xlane.f32.xlu1 %v3391_v50  ;;  %v1253_v12 = vrot.slane %v1252_v1, 4  ;;  %v1246_v14 = vsel %vm1155_vm0, %v1018_v10, -inf  ;;  %v706_v59 = vrot.slane %v692_v57, %v3117_v62  ;;  %v1260_v61 = vrot.slane %v1259_v29, 4 }
  0xe1   : > { %v1332_v42 = vrot.slane %v1331_v2, 2  ;;  %v1183_v48 = vsel %vm1155_vm0, %v879_v21, -inf  ;;  %v1357_v55 = vmax.f32 %v1246_v14, %v3416_v7  ;;  %v1327_v56 = vrot.slane %v1326_v27, 1 }
  0xe2   : > { %v745_v24 = vcombine.low %v706_v59, %v738_v46  ;;  %v1351_v8 = vrot.slane %v1350_v49, 4  ;;  %v1267_v13 = vrot.slane %v1266_v5, 4  ;;  %v1339_v6 = vrot.slane %v1338_v58, 2 }
  0xe3   : > { %v1345_v31 = vmax.f32 %v1343_v45, %v1344_v51  ;;  %v874_v32 = vrot.slane %v860_v41, %v3117_v62  ;;  %v1254_v36 = vmax.f32 %v1252_v1, %v1253_v12  ;;  %v1273_v28 = vmax.f32 %v3355_v34, %v1177_v19 }
  0xe4   : > { %1178 = vmax.xlane.f32.xlu0 %v1177_v19  ;;  %1241 = vmax.xlane.f32.xlu1 %v1240_v52  ;;  %v880_v9 = vcombine.high %v835_v53, %v3399_v63  ;;  %v1261_v15 = vmax.f32 %v1259_v29, %v1260_v61  ;;  %v1333_v16 = vmax.f32 %v1331_v2, %v1332_v42  ;;  %v1358_v0 = vrot.slane %v1357_v55, 4 }
  0xe5   : > { %v842_v17 = vrot.slane %v828_v33, %v3117_v62  ;;  %v1328_v60 = vmax.f32 %v1326_v27, %v1327_v56  ;;  %v1192_v18 = vsel %vm1155_vm0, %v745_v24, -inf  ;;  %v1352_v4 = vmax.f32 %v1350_v49, %v1351_v8 }
  0xe6   : > { %v746_v11 = vcombine.high %v706_v59, %v738_v46  ;;  %v1268_v22 = vmax.f32 %v1266_v5, %v1267_v13  ;;  %v1340_v37 = vmax.f32 %v1338_v58, %v1339_v6  ;;  %v1346_v26 = vrot.slane %v1345_v31, 2 }
  0xe7   : > { %v881_v35 = vcombine.low %v842_v17, %v874_v32  ;;  %v1274_v34 = vrot.slane %v1273_v28, 4  ;;  %v1280_v25 = vmax.f32 %v3391_v50, %v1183_v48  ;;  %v1189_v30 = vsel %vm1155_vm0, %v880_v9, -inf }
  0xe8   : > { %1238 = vmax.xlane.f32.xlu0 %v1237_v38  ;;  %1187 = vmax.xlane.f32.xlu1 %v1186_v23  ;;  %v1255_v38 = vrot.slane %v1254_v36, 2  ;;  %v1262_v19 = vrot.slane %v1261_v15, 2  ;;  %v1334_v63 = vrot.slane %v1333_v16, 1  ;;  %v1359_v62 = vmax.f32 %v1357_v55, %v1358_v0 }
  0xe9   : > { %v1591_v43 = vsel %vm1546_vm2, %v1328_v60, %v3227_v3  ;;  %v1353_v52 = vrot.slane %v1352_v4, 2  ;;  %v1198_v39 = vsel %vm1155_vm0, %v746_v11, -inf  ;;  %v882_v47 = vcombine.high %v842_v17, %v874_v32 }
  0xea   : > { %v1341_v20 = vrot.slane %v1340_v37, 1  ;;  %v1347_v45 = vmax.f32 %v1345_v31, %v1346_v26  ;;  %v1287_v53 = vmax.f32 %v1186_v23, %v1189_v30  ;;  %v1195_v50 = vsel %vm1155_vm0, %v881_v35, -inf }
  0xeb   : > { %v1269_v57 = vrot.slane %v1268_v22, 2  ;;  %v1275_v1 = vmax.f32 %v1273_v28, %v1274_v34  ;;  %v1281_v10 = vrot.slane %v1280_v25, 4  ;;  %v1263_v27 = vmax.f32 %v1261_v15, %v1262_v19 }
  0xec   : > { %1184 = vmax.xlane.f32.xlu0 %v1183_v48  ;;  %1247 = vmax.xlane.f32.xlu1 %v1246_v14  ;;  %v1335_v29 = vmax.f32 %v1333_v16, %v1334_v63  ;;  %v1360_v2 = vrot.slane %v1359_v62, 2  ;;  %v1354_v21 = vmax.f32 %v1352_v4, %v1353_v52  ;;  %v1294_v3 = vmax.f32 %v1192_v18, %v1195_v50 }
  0xed   : > { %v1201_v46 = vsel %vm1155_vm0, %v882_v47, -inf  ;;  %v1342_v49 = vmax.f32 %v1340_v37, %v1341_v20  ;;  %v1348_v41 = vrot.slane %v1347_v45, 1  ;;  %v1288_v5 = vrot.slane %v1287_v53, 4 }
  0xee   : > { %v1592_v23 = vsel %vm1548_vm3, %v1335_v29, %v1591_v43  ;;  %v1270_v51 = vmax.f32 %v1268_v22, %v1269_v57  ;;  %v1276_v33 = vrot.slane %v1275_v1, 2  ;;  %v1282_v12 = vmax.f32 %v1280_v25, %v1281_v10  ;;  %v3457_v10 = vld [vmem:[%s3708_s4] sm:$0xf] }
  0xef   : > { %v1264_v14 = vrot.slane %v1263_v27, 1  ;;  %v1361_v59 = vmax.f32 %v1359_v62, %v1360_v2  ;;  %v1301_v61 = vmax.f32 %v1198_v39, %v1201_v46  ;;  %v1355_v42 = vrot.slane %v1354_v21, 1 }
  0xf0   : > { %1244 = vmax.xlane.f32.xlu0 %v1243_v54  ;;  %1193 = vmax.xlane.f32.xlu1 %v1192_v18  ;;  %v1256_v54 = vmax.f32 %v1254_v36, %v1255_v38  ;;  %v1295_v48 = vrot.slane %v1294_v3, 4  ;;  %v1349_v55 = vmax.f32 %v1347_v45, %v1348_v41  ;;  %v1289_v56 = vmax.f32 %v1287_v53, %v1288_v5 }
  0xf1   : > { %v1271_v8 = vrot.slane %v1270_v51, 1  ;;  %v1277_v13 = vmax.f32 %v1275_v1, %v1276_v33  ;;  %v1283_v6 = vrot.slane %v1282_v12, 2  ;;  %v1265_v31 = vmax.f32 %v1263_v27, %v1264_v14 }
  0xf2   : > { %v1257_v58 = vrot.slane %v1256_v54, 1  ;;  %v1362_v32 = vrot.slane %v1361_v59, 1  ;;  %v1302_v36 = vrot.slane %v1301_v61, 4  ;;  %v1356_v9 = vmax.f32 %v1354_v21, %v1355_v42 }
  0xf3   : > { %v1296_v15 = vmax.f32 %v1294_v3, %v1295_v48  ;;  %v1290_v16 = vrot.slane %v1289_v56, 2  ;;  %v1272_v0 = vmax.f32 %v1270_v51, %v1271_v8  ;;  %v1284_v17 = vmax.f32 %v1282_v12, %v1283_v6 }
  0xf4   : > { %1190 = vmax.xlane.f32.xlu0 %v1189_v30  ;;  %1199 = vmax.xlane.f32.xlu1 %v1198_v39  ;;  %v1258_v24 = vmax.f32 %v1256_v54, %v1257_v58  ;;  %v2789_v18 = vmov 0.0   ;;  %v1278_v11 = vrot.slane %v1277_v13, 1  ;;  %v1303_v22 = vmax.f32 %v1301_v61, %v1302_v36 }
  0xf5   : > { %2591 = vmatprep.subr.mxu1 %v2789_v18  ;;  %2394 = vmatprep.mubr.f32.mxu0 %v2789_v18  ;;  %v1363_v37 = vmax.f32 %v1361_v59, %v1362_v32  ;;  %v1297_v35 = vrot.slane %v1296_v15, 2  ;;  %v1291_v38 = vmax.f32 %v1289_v56, %v1290_v16  ;;  %v1285_v19 = vrot.slane %v1284_v17, 1 }
  0xf6   : > { %v1583_v4 = vsel %vm1544_vm1, %v1265_v31, %v1258_v24  ;;  %v1279_v63 = vmax.f32 %v1277_v13, %v1278_v11  ;;  %v1304_v62 = vrot.slane %v1303_v22, 2  ;;  %2595 = vmatprep.mubr.msk.f32.mxu1 %vm2790_vm8, %v2789_v18  ;;  %v1397_v32 = vand.u32 127, %v616_v40 }
  0xf7   : > { %v1584_v30 = vsel %vm1546_vm2, %v1272_v0, %v1583_v4  ;;  %v1298_v52 = vmax.f32 %v1296_v15, %v1297_v35  ;;  %v1292_v39 = vrot.slane %v1291_v38, 1  ;;  %v1286_v45 = vmax.f32 %v1284_v17, %v1285_v19 }
  0xf8   : > { %1250 = vmax.xlane.f32.xlu0 %v3416_v7  ;;  %v1593_v7 = vsel %vm1550_vm4, %v1342_v49, %v1592_v23  ;;  %v1585_v47 = vsel %vm1548_vm3, %v1279_v63, %v1584_v30  ;;  %v1305_v54 = vmax.f32 %v1303_v22, %v1304_v62  ;;  %v3494_v17 = vsub.s32 %v1397_v32, %v3091_v44 }
  0xf9   : > { %v1594_v28 = vsel %vm1552_vm5, %v1349_v55, %v1593_v7  ;;  %v2564_v26 = vpop.f32.mrf.mxu0  ;;  %v1299_v57 = vrot.slane %v1298_v52, 1  ;;  %v1586_v1 = vsel %vm1550_vm4, %v1286_v45, %v1585_v47  ;;  %v1293_v27 = vmax.f32 %v1291_v38, %v1292_v39 }
  0xfa   : > { %v1595_v60 = vsel %vm1554_vm6, %v1356_v9, %v1594_v28  ;;  %v1306_v29 = vrot.slane %v1305_v54, 1  ;;  %v1402_v28 = vadd.s32 4294967288, %v1397_v32 }
  0xfb   : > { %v1596_v34 = vsel %vm1556_vm7, %v1363_v37, %v1595_v60  ;;  %v2565_v25 = vpop.f32.mrf.mxu0  ;;  %v1587_v2 = vsel %vm1552_vm5, %v1293_v27, %v1586_v1  ;;  %v1300_v21 = vmax.f32 %v1298_v52, %v1299_v57 }
  0xfc   : > { %1196 = vmax.xlane.f32.xlu0 %v1195_v50  ;;  %v2566_v53 = vadd.f32 %v2565_v25, %v2564_v26  ;;  %v3489_v16 = vsub.s32 %v1402_v28, %v3091_v44 }
  0xfd   : > { %v2567_v43 = vpop.f32.mrf.mxu0  ;;  %v1588_v3 = vsel %vm1554_vm6, %v1300_v21, %v1587_v2 }
  0xff   : > { %v2568_v20 = vpop.f32.mrf.mxu0 }
 0x100   : > { %1202 = vmax.xlane.f32.xlu0 %v1201_v46  ;;  %v2569_v50 = vadd.f32 %v2568_v20, %v2567_v43  ;;  %v1307_v46 = vmax.f32 %v1305_v54, %v1306_v29 }
 0x102   : > { %2592 = vmatpush3.msra.mxu1 %v2569_v50  ;;  %v1589_v49 = vsel %vm1556_vm7, %v1307_v46, %v1588_v3 }
 0x103   : > { %2593 = vmatprep.subr.mxu1 %v2789_v18 }
 0x104   : > { %2594 = vmatpush3.msra.mxu1 %v2566_v53 }
 0x105   : > { %1599 = vrot.lane.b32.xlu1 %v1596_v34, %s3745_s17  ;;  %2598 = vmatprep.subr.mxu1 %v2789_v18 }
 0x106   : > { %2596 = vmatmul.mubr.msk.f32.vlgmr.msra.gmra.mxu1 %vm1155_vm0, %v3457_v10 }
 0x107   : > { %2602 = vmatprep.mubr.msk.f32.mxu1 %vm2790_vm8, %v2789_v18 }
 0x116   : > { %1597 = vrot.lane.b32.xlu0 %v1589_v49, %s3745_s17 }
 0x131   : > { %v1206_v5 = vpop.xlane.xlu0 %1205 }
 0x132   : > { %v1475_v26 = vrot.slane %v1206_v5, %v3494_v17 }
 0x135   : > { %v1212_v58 = vpop.xlane.xlu0 %1211 }
 0x136   : > { %v1484_v35 = vrot.slane %v1212_v58, %v3494_v17 }
 0x13d   : > { %v1209_v41 = vpop.xlane.xlu1 %1208  ;;  %v1215_v33 = vpop.xlane.xlu0 %1214 }
 0x13e   : > { %v1479_v4 = vrot.slane %v1209_v41, %v3489_v16  ;;  %v1488_v11 = vrot.slane %v1215_v33, %v3489_v16 }
 0x140   : > { %v1480_v25 = vsel %vm1407_vm9, %v1479_v4, %v1475_v26  ;;  %v1489_v30 = vsel %vm1407_vm9, %v1488_v11, %v1484_v35 }
 0x141   : > { %v1218_v23 = vpop.xlane.xlu1 %1217  ;;  %v1221_v14 = vpop.xlane.xlu0 %1220  ;;  %v1558_v45 = vsel %vm1544_vm1, %v1489_v30, %v1480_v25 }
 0x142   : > { %v1493_v40 = vrot.slane %v1218_v23, %v3494_v17  ;;  %v1497_v22 = vrot.slane %v1221_v14, %v3489_v16 }
 0x144   : > { %v1498_v62 = vsel %vm1407_vm9, %v1497_v22, %v1493_v40 }
 0x145   : > { %v1559_v1 = vsel %vm1546_vm2, %v1498_v62, %v1558_v45 }
 0x14d   : > { %v3469_v51 = vpop.xlane.xlu1 %1157 }
 0x14e   : > { %v1401_v27 = vrot.slane %v3469_v51, %v3494_v17 }
 0x151   : > { %v3471_v12 = vpop.xlane.xlu1 %1163 }
 0x152   : > { %v1412_v29 = vrot.slane %v3471_v12, %v3494_v17 }
 0x155   : > { %v1224_v59 = vpop.xlane.xlu1 %1223 }
 0x156   : > { %v1502_v19 = vrot.slane %v1224_v59, %v3494_v17 }
 0x159   : > { %v3473_v61 = vpop.xlane.xlu0 %1160  ;;  %v3475_v42 = vpop.xlane.xlu1 %1169 }
 0x15a   : > { %v1406_v21 = vrot.slane %v3473_v61, %v3489_v16  ;;  %v1421_v33 = vrot.slane %v3475_v42, %v3494_v17 }
 0x15d   : > { %v1167_v48 = vpop.xlane.xlu0 %1166  ;;  %v1230_v7 = vpop.xlane.xlu1 %1229 }
 0x15e   : > { %v1511_v43 = vrot.slane %v1230_v7, %v3494_v17  ;;  %v1416_v53 = vrot.slane %v1167_v48, %v3489_v16 }
 0x160   : > { %v1417_v12 = vsel %vm1407_vm9, %v1416_v53, %v1412_v29 }
 0x161   : > { %v1227_v55 = vpop.xlane.xlu0 %1226  ;;  %v3477_v56 = vpop.xlane.xlu1 %1175 }
 0x162   : > { %v1506_v38 = vrot.slane %v1227_v55, %v3489_v16  ;;  %v1430_v61 = vrot.slane %v3477_v56, %v3494_v17 }
 0x164   : > { %v1507_v47 = vsel %vm1407_vm9, %v1506_v38, %v1502_v19 }
 0x165   : > { %v3479_v24 = vpop.xlane.xlu0 %1172  ;;  %v1236_v8 = vpop.xlane.xlu1 %1235  ;;  %v1560_v3 = vsel %vm1548_vm3, %v1507_v47, %v1559_v1 }
 0x166   : > { %v1520_v20 = vrot.slane %v1236_v8, %v3494_v17  ;;  %v1425_v46 = vrot.slane %v3479_v24, %v3489_v16  ;;  %v1408_v24 = vsel %vm1407_vm9, %v1406_v21, %v1401_v27 }
 0x168   : > { %v1426_v42 = vsel %vm1407_vm9, %v1425_v46, %v1421_v33 }
 0x169   : > { %v1233_v13 = vpop.xlane.xlu0 %1232  ;;  %v3481_v6 = vpop.xlane.xlu1 %1181 }
 0x16a   : > { %v1515_v44 = vrot.slane %v1233_v13, %v3489_v16  ;;  %v1439_v8 = vrot.slane %v3481_v6, %v3494_v17 }
 0x16c   : > { %v1516_v50 = vsel %vm1407_vm9, %v1515_v44, %v1511_v43 }
 0x16d   : > { %v3483_v31 = vpop.xlane.xlu0 %1178  ;;  %v1242_v36 = vpop.xlane.xlu1 %1241  ;;  %v1561_v5 = vsel %vm1550_vm4, %v1516_v50, %v1560_v3 }
 0x16e   : > { %v1529_v54 = vrot.slane %v1242_v36, %v3494_v17  ;;  %v1434_v23 = vrot.slane %v3483_v31, %v3489_v16 }
 0x170   : > { %v1435_v36 = vsel %vm1407_vm9, %v1434_v23, %v1430_v61  ;;  %v2014_v23 = vld [vmem:[%s3712_s8] sm:$0xff] }
 0x171   : > { %v1239_v9 = vpop.xlane.xlu0 %1238  ;;  %v3486_v15 = vpop.xlane.xlu1 %1187 }
 0x172   : > { %v1524_v63 = vrot.slane %v1239_v9, %v3489_v16  ;;  %v1448_v56 = vrot.slane %v3486_v15, %v3494_v17 }
 0x174   : > { %v1525_v2 = vsel %vm1407_vm9, %v1524_v63, %v1520_v20  ;;  %v2791_v20 = vmov 0  }
 0x175   : > { %v3491_v0 = vpop.xlane.xlu0 %1184  ;;  %v1248_v60 = vpop.xlane.xlu1 %1247  ;;  %v1562_v14 = vsel %vm1552_vm5, %v1525_v2, %v1561_v5  ;;  %2688 = vset.pattern.permute.xlu1 %v2791_v20  ;;  %2689 = vset.pattern.permute.xlu0 %v2791_v20 }
 0x176   : > { %v1538_v58 = vrot.slane %v1248_v60, %v3494_v17  ;;  %v1443_v59 = vrot.slane %v3491_v0, %v3489_v16  ;;  %v1545_v0 = vsel %vm1544_vm1, %v1417_v12, %v1408_v24  ;;  %v2015_v24 = vld [vmem:[%s3712_s8 + $0x8] sm:$0xff] }
 0x177   : > { %v1547_v6 = vsel %vm1546_vm2, %v1426_v42, %v1545_v0  ;;  %v2122_v42 = vld [vmem:[%s3714_s10] sm:$0xff] }
 0x178   : > { %v1444_v60 = vsel %vm1407_vm9, %v1443_v59, %v1439_v8  ;;  %v1549_v40 = vsel %vm1548_vm3, %v1435_v36, %v1547_v6  ;;  %v2017_v8 = vld [vmem:[%s3713_s9 + $0x8] sm:$0xff]  ;;  %v2233_v0 = vld [vmem:[%s3706_s2] sm:$0xff] }
 0x179   : > { %v1245_v37 = vpop.xlane.xlu0 %1244  ;;  %v1194_v34 = vpop.xlane.xlu1 %1193  ;;  %v2123_v36 = vld [vmem:[%s3714_s10 + $0x8] sm:$0xff] }
 0x17a   : > { %v1533_v52 = vrot.slane %v1245_v37, %v3489_v16  ;;  %v1457_v4 = vrot.slane %v1194_v34, %v3494_v17  ;;  %v1551_v37 = vsel %vm1550_vm4, %v1444_v60, %v1549_v40 }
 0x17c   : > { %v1534_v49 = vsel %vm1407_vm9, %v1533_v52, %v1529_v54 }
 0x17d   : > { %v1191_v39 = vpop.xlane.xlu0 %1190  ;;  %v1200_v57 = vpop.xlane.xlu1 %1199  ;;  %v1563_v48 = vsel %vm1554_vm6, %v1534_v49, %v1562_v14 }
 0x17e   : > { %v1452_v7 = vrot.slane %v1191_v39, %v3489_v16  ;;  %v1466_v26 = vrot.slane %v1200_v57, %v3494_v17  ;;  %v1681_v39 = vld [vmem:[%s3709_s5 + $0x8] sm:$0xff] }
 0x180   : > { %v1453_v11 = vsel %vm1407_vm9, %v1452_v7, %v1448_v56  ;;  %v2236_v56 = vld [vmem:[%s3706_s2 + $0x18] sm:$0xff] }
 0x181   : > { %v1251_v41 = vpop.xlane.xlu0 %1250  ;;  %v1600_v13 = vpop.permute.xlu1 %1599  ;;  %v1553_v38 = vsel %vm1552_vm5, %v1453_v11, %v1551_v37 }
 0x182   : > { %v1542_v51 = vrot.slane %v1251_v41, %v3489_v16  ;;  %v1929_v41 = vld [vmem:[%s3710_s6] sm:$0xff] }
 0x184   : > { %v1543_v55 = vsel %vm1407_vm9, %v1542_v51, %v1538_v58  ;;  %v2016_v58 = vld [vmem:[%s3713_s9] sm:$0xff] }
 0x185   : > { %v1197_v31 = vpop.xlane.xlu0 %1196  ;;  %v1564_v32 = vsel %vm1556_vm7, %v1543_v55, %v1563_v48  ;;  %2020 = vperm.xlu0 %2689, %v2016_v58  }
 0x186   : > { %v1461_v28 = vrot.slane %v1197_v31, %v3489_v16  ;;  %v1604_v9 = vsel %vm1155_vm0, %v1564_v32, %v1600_v13  ;;  %v2125_v13 = vld [vmem:[%s3715_s11 + $0x8] sm:$0xff]  ;;  %v2124_v31 = vld [vmem:[%s3715_s11] sm:$0xff] }
 0x187   : > { %2599 = vmatpush3.msra.mxu1 %v1604_v9  ;;  %v2234_v9 = vld [vmem:[%s3706_s2 + $0x8] sm:$0xff] }
 0x188   : > { %2600 = vmatprep.subr.mxu1 %v2789_v18  ;;  %v1462_v15 = vsel %vm1407_vm9, %v1461_v28, %v1457_v4  ;;  %v2235_v28 = vld [vmem:[%s3706_s2 + $0x10] sm:$0xff] }
 0x189   : > { %v1203_v22 = vpop.xlane.xlu0 %1202  ;;  %v1555_v44 = vsel %vm1554_vm6, %v1462_v15, %v1553_v38  ;;  %2133 = vperm.xlu0 %2689, %v2125_v13   ;;  %v2321_v38 = vld [vmem:[%s3707_s3 + $0x8] sm:$0xff] }
 0x18a   : > { %v1470_v35 = vrot.slane %v1203_v22, %v3489_v16  ;;  %v1680_v16 = vld [vmem:[%s3709_s5] sm:$0xff] }
 0x18c   : > { %v1471_v34 = vsel %vm1407_vm9, %v1470_v35, %v1466_v26  ;;  %v2323_v26 = vld [vmem:[%s3707_s3 + $0x18] sm:$0xff]  ;;  %v2322_v35 = vld [vmem:[%s3707_s3 + $0x10] sm:$0xff] }
 0x18d   : > { %v1557_v25 = vsel %vm1556_vm7, %v1471_v34, %v1555_v44  ;;  %v1598_v30 = vpop.permute.xlu0 %1597  ;;  %2358 = vmatprep.subr.mxu0 %v2323_v26  ;;  %v2320_v34 = vld [vmem:[%s3707_s3] sm:$0xff] }
 0x18e   : > { %v1603_v19 = vsel %vm1155_vm0, %v1557_v25, %v1598_v30  ;;  %2359 = vmatpush1.msra.mxu0 %v2322_v35 }
 0x18f   : > { %2601 = vmatpush3.msra.mxu1 %v1603_v19  ;;  %2360 = vmatprep.subr.mxu0 %v2321_v38 }
 0x190   : > { %2603 = vmatmul.mubr.msk.f32.vlgmr.msra.gmra.mxu1 %vm1155_vm0, %v3457_v10  ;;  %v1930_v10 = vld [vmem:[%s3711_s7] sm:$0xff]  ;;  %2361 = vmatpush1.msra.mxu0 %v2320_v34 }
 0x191   : > { %2607 = vmatprep.mubr.msk.f32.mxu1 %vm1753_vm10, %v1680_v16  ;;  %1933 = vperm.xlu1 %2688, %v1930_v10  }
 0x1c6   : > { %v1675_v63 = vpop.f32.mrf.mxu1 }
 0x1c7   : > { %v1679_v47 = vmax.f32 %v1675_v63, 0.0 }
 0x1c8   : > { %v2597_v62 = vpop.f32.mrf.mxu1 }
 0x200   : > { %v2021_v60 = vpop.permute.xlu0 %2020 }
 0x20c   : > { %v1934_v51 = vpop.permute.xlu1 %1933 }
 0x250   : > { %v1748_v17 = vpop.f32.mrf.mxu1 }
 0x251   : > { %v1752_v43 = vmax.f32 %v1748_v17, 0.0 }
 0x252   : > { %v2604_v52 = vpop.f32.mrf.mxu1 }
 0x253   : > { %2605 = vmatprep.subr.msk.mxu1 %vm1760_vm11, %v1752_v43 }
 0x254   : > { %2606 = vmatpush3.msk.msra.mxu1 %vm1760_vm11, %v1752_v43 }
 0x255   : > { %2608 = vmatmul.mubr.msk.f32.vlgmr.msra.gmra.mxu1 %vm1753_vm10, %v1681_v39  ;;  %2610 = vmatprep.subr.msk.mxu1 %vm1760_vm11, %v1679_v47 }
 0x256   : > { %2611 = vmatpush3.msk.msra.mxu1 %vm1760_vm11, %v1679_v47  ;;  %2612 = vmatprep.mubr.msk.f32.mxu1 %vm1753_vm10, %v1680_v16  ;;  %v2134_v16 = vpop.permute.xlu0 %2133 }
 0x257   : > { %2615 = vmatprep.subr.mxu1 %v2789_v18 }
 0x259   : > { %2613 = vmatmul.mubr.msk.f32.vlgmr.msra.gmra.mxu1 %vm1753_vm10, %v1681_v39 }
 0x25a   : > { %2619 = vmatprep.mubr.msk.f32.mxu1 %vm2790_vm8, %v2789_v18 }
 0x315   : > { %v2609_v45 = vpop.f32.mrf.mxu1 }
 0x317   : > { %v1830_v53 = vpop.f32.mrf.mxu1 }
 0x319   : > { %v2614_v50 = vpop.f32.mrf.mxu1 }
 0x31a   : > { %v1914_v54 = vadd.f32 %v2614_v50, %v2609_v45 }
 0x31b   : > { %v1908_v57 = vpop.f32.mrf.mxu1 }
 0x31c   : > { %v2511_v1 = vmul.f32 -1.442695, %v1914_v54  ;;  %v1909_v27 = vadd.f32 %v1908_v57, %v1830_v53 }
 0x31e   : > { %2690 = vpow2.f32 %v2511_v1  ;;  %v2510_v29 = vmul.f32 -1.442695, %v1909_v27 }
 0x320   : > { %2692 = vpow2.f32 %v2510_v29 }
 0x32b   : > { %v2691_v2 = vpop.eup %2690 }
 0x32c   : > { %v1924_v21 = vadd.f32 1.0, %v2691_v2 }
 0x32d   : > { %v2693_v3 = vpop.eup %2692 }
 0x32e   : > { %2694 = vrcp.f32 %v1924_v21  ;;  %v1923_v46 = vadd.f32 1.0, %v2693_v3 }
 0x330   : > { %2696 = vrcp.f32 %v1923_v46 }
 0x33b   : > { %v2695_v49 = vpop.eup %2694 }
 0x33c   : > { %2616 = vmatpush3.msra.mxu1 %v2695_v49 }
 0x33d   : > { %v2697_v5 = vpop.eup %2696  ;;  %2617 = vmatprep.subr.mxu1 %v2789_v18 }
 0x33e   : > { %2618 = vmatpush3.msra.mxu1 %v2697_v5 }
 0x33f   : > { %2620 = vmatmul.mubr.msk.f32.vlgmr.msra.gmra.mxu1 %vm1155_vm0, %v1929_v41  ;;  %v2714_v41 = vld [vmem:[%s2924_s16 + $0x10] sm:$0xff] }
 0x340   : > { %2624 = vmatprep.mubr.msk.f32.mxu1 %vm2028_vm12, %v2014_v23 }
 0x3ff   : > { %v2005_v33 = vpop.f32.mrf.mxu1 }
 0x400   : > { %v2006_v12 = vadd.f32 %v2005_v33, %v1934_v51  ;;  %v2715_v33 = vld [vmem:[%s2924_s16] sm:$0xff] }
 0x401   : > { %v2621_v14 = vpop.f32.mrf.mxu1 }
 0x402   : > { %v2009_v59 = vadd.f32 2.0, %v2006_v12  ;;  %v2716_v14 = vld [vmem:[%s2924_s16 + $0x18] sm:$0xff] }
 0x404   : > { %v2010_v61 = vmax.f32 %v2009_v59, 0.0 }
 0x406   : > { %v2011_v48 = vmin.f32 %v2010_v61, 6.0 }
 0x408   : > { %v2012_v7 = vmul.f32 0.25, %v2011_v48  ;;  %v2717_v48 = vld [vmem:[%s2924_s16 + $0x8] sm:$0xff] }
 0x40a   : > { %v2013_v55 = vmul.f32 %v2012_v7, %v2006_v12 }
 0x40c   : > { %2137 = vrot.lane.b32.xlu1 %v2013_v55, %s3748_s27  ;;  %2622 = vmatprep.subr.mxu1 %v2013_v55  ;;  %s2531_s27 = sshll.u32 %s2880_s25, 9 }
 0x40d   : > { %2623 = vmatpush3.msra.mxu1 %v2013_v55  ;;  %s3661_s25 = scalar_lea.hbm %s3716_s12, %s2531_s27 }
 0x40e   : > { %2625 = vmatmul.mubr.msk.f32.vlgmr.msra.gmra.mxu1 %vm2028_vm12, %v2015_v24 }
 0x40f   : > { %2629 = vmatprep.mubr.msk.f32.mxu1 %vm2028_vm12, %v2122_v42 }
 0x410   : > { %2025 = vperm.xlu1 %2688, %v2017_v8  }
 0x414   : > { %2128 = vperm.xlu1 %2688, %v2124_v31  }
 0x47e   : > { %v2138_v32 = vpop.permute.xlu1 %2137 }
 0x47f   : > { %2627 = vmatprep.subr.mxu1 %v2138_v32 }
 0x480   : > { %2628 = vmatpush3.msra.mxu1 %v2138_v32 }
 0x481   : > { %2630 = vmatmul.mubr.msk.f32.vlgmr.msra.gmra.mxu1 %vm2028_vm12, %v2123_v36  ;;  %2271 = vmatprep.subr.mxu1 %v2236_v56 }
 0x482   : > { %2272 = vmatpush1.msra.mxu1 %v2235_v28  ;;  %2307 = vmatprep.mubr.f32.mxu1 %v2789_v18 }
 0x483   : > { %2273 = vmatprep.subr.mxu1 %v2234_v9 }
 0x484   : > { %2274 = vmatpush1.msra.mxu1 %v2233_v0 }
 0x485   : > { %2632 = vmatprep.subr.mxu1 %v2323_v26 }
 0x48b   : > { %v2026_v4 = vpop.permute.xlu1 %2025 }
 0x48f   : > { %v2129_v52 = vpop.permute.xlu1 %2128 }
 0x4ce   : > { %v2626_v6 = vpop.f32.mrf.mxu1 }
 0x4cf   : > { %v2107_v11 = vadd.f32 %v2626_v6, %v2026_v4 }
 0x4d0   : > { %v2101_v40 = vpop.f32.mrf.mxu1 }
 0x4d1   : > { %v2516_v15 = vmul.f32 -1.442695, %v2107_v11  ;;  %v2102_v22 = vadd.f32 %v2101_v40, %v2021_v60 }
 0x4d3   : > { %v2515_v37 = vmul.f32 -1.442695, %v2102_v22  ;;  %2698 = vpow2.f32 %v2516_v15 }
 0x4d5   : > { %2700 = vpow2.f32 %v2515_v37 }
 0x4e0   : > { %v2699_v44 = vpop.eup %2698 }
 0x4e1   : > { %v2117_v19 = vadd.f32 1.0, %v2699_v44 }
 0x4e2   : > { %v2701_v25 = vpop.eup %2700 }
 0x4e3   : > { %v2116_v30 = vadd.f32 1.0, %v2701_v25 }
 0x4e5   : > { %2702 = vrcp.f32 %v2116_v30 }
 0x4e6   : > { %2704 = vrcp.f32 %v2117_v19 }
 0x4f2   : > { %v2703_v63 = vpop.eup %2702 }
 0x4f3   : > { %2521 = vmatmul.mubr.msk.f32.vlgmr.msra.gmra.mxu1 %vm1155_vm0, %v2703_v63  ;;  %v2705_v62 = vpop.eup %2704 }
 0x4f4   : > { %2313 = vmatprep.mubr.f32.mxu1 %v2789_v18  ;;  %2634 = vmatpush1.msra.mxu1 %v2322_v35 }
 0x4f5   : > { %2633 = vmatprep.subr.mxu1 %v2321_v38 }
 0x4f6   : > { %2635 = vmatpush1.msra.mxu1 %v2320_v34 }
 0x4f7   : > { %2522 = vmatmul.mubr.msk.f32.gmra.mxu1 %vm1155_vm0, %v2705_v62 }
 0x4f8   : > { %2400 = vmatprep.mubr.f32.mxu1 %v2789_v18 }
 0x541   : > { %v2631_v17 = vpop.f32.mrf.mxu1 }
 0x542   : > { %v2218_v43 = vadd.f32 %v2631_v17, %v2134_v16 }
 0x543   : > { %v2212_v39 = vpop.f32.mrf.mxu1 }
 0x544   : > { %v2520_v47 = vmul.f32 -1.442695, %v2218_v43  ;;  %v2213_v10 = vadd.f32 %v2212_v39, %v2129_v52 }
 0x546   : > { %2706 = vpow2.f32 %v2520_v47  ;;  %v2519_v20 = vmul.f32 -1.442695, %v2213_v10 }
 0x548   : > { %2708 = vpow2.f32 %v2519_v20 }
 0x553   : > { %v2707_v45 = vpop.eup %2706 }
 0x554   : > { %v2228_v53 = vadd.f32 1.0, %v2707_v45 }
 0x555   : > { %v2709_v50 = vpop.eup %2708 }
 0x556   : > { %2710 = vrcp.f32 %v2228_v53  ;;  %v2227_v54 = vadd.f32 1.0, %v2709_v50 }
 0x558   : > { %2712 = vrcp.f32 %v2227_v54 }
 0x563   : > { %v2711_v57 = vpop.eup %2710 }
 0x564   : > { %2524 = vmatmul.mubr.msk.f32.vlgmr.msra.gmra.mxu1 %vm1155_vm0, %v2711_v57 }
 0x565   : > { %v2713_v18 = vpop.eup %2712 }
 0x566   : > { %2523 = vmatmul.mubr.msk.f32.vlgmr.msra.gmra.mxu0 %vm1155_vm0, %v2713_v18 }
 0x5b3   : > { %v2309_v1 = vpop.f32.mrf.mxu1 }
 0x5b5   : > { %v2311_v27 = vpop.f32.mrf.mxu1 }
 0x5b7   : > { %v2315_v29 = vpop.f32.mrf.mxu1 }
 0x5b9   : > { %v2317_v2 = vpop.f32.mrf.mxu1 }
 0x624   : > { %v2402_v21 = vpop.f32.mrf.mxu1 }
 0x625   : > { %v2409_v3 = vmul.f32 %v2402_v21, %v2315_v29 }
 0x626   : > { %v2396_v46 = vpop.f32.mrf.mxu0  ;;  %v2404_v49 = vpop.f32.mrf.mxu1 }
 0x627   : > { %v2413_v5 = vmul.f32 %v2714_v41, %v2409_v3  ;;  %v2407_v23 = vmul.f32 %v2396_v46, %v2309_v1  ;;  %v2410_v58 = vmul.f32 %v2404_v49, %v2317_v2 }
 0x628   : > { %v2398_v51 = vpop.f32.mrf.mxu0 }
 0x629   : > { %2417 = vst [vmem:[%s406_s0 + $0x10] sm:$0xff] %v2413_v5  ;;  %v2411_v12 = vmul.f32 %v2715_v33, %v2407_v23  ;;  %v2414_v59 = vmul.f32 %v2716_v14, %v2410_v58  ;;  %v2408_v61 = vmul.f32 %v2398_v51, %v2311_v27 }
 0x62b   : > { %2415 = vst [vmem:[%s406_s0] sm:$0xff] %v2411_v12  ;;  %2418 = vst [vmem:[%s406_s0 + $0x18] sm:$0xff] %v2414_v59  ;;  %v2412_v7 = vmul.f32 %v2717_v48, %v2408_v61 }
 0x62d   : > { %2416 = vst [vmem:[%s406_s0 + $0x8] sm:$0xff] %v2412_v7 }
 0x62e   : > { %2731 = shalt.err (!%p2728_p3)
}
 0x62f   : > { %s2732_s16 = scalar_lea.hbm %s3661_s25, 512  ;;  %s2736_s0 = scalar_lea.hbm %s3716_s12, 1024 }
 0x630   : > { %p2733_p4 = scmp.ne.s32.totalorder %s3661_s25, %s2732_s16  ;;  %p2737_p9 = scmp.lt.s32.totalorder %s3661_s25, %s3716_s12 }
 0x631   : > { %p2738_p10 = scmp.lt.s32.totalorder %s2736_s0, %s2732_s16 }
 0x632   : > { %p2734_p7 = pnand %p2733_p4, %p2897_p5 }
 0x633   : > { %p2739_p11 = por %p2738_p10, %p2737_p9 }
 0x634   : > { %p2735_p8 = pneg %p2734_p7 }
 0x636   : > { %p2740_p12 = pnand %p2739_p11, %p2735_p8 }
 0x638   : > { %2743 = shalt.err (!%p2740_p12)
}
 0x639   : > { %s2793_s20 = smov 256  }
 0x63a   : > { %2636 = dma.vmem_to_hbm [thread:$0]  (%p2897_p5), %s3655_s14, 512, %s3661_s25, %s3663_s19, %s2793_s20, %s2793_s20, %s3745_s17  }
 0x63b PF: > { %p2642_p13 = scmp.ge.s32.totalorder %s2778_s24, 2  ;;  %s2448_s23 = sand.u32 1, %s2766_s21  }
 0x63c   : > { %s2449_s26 = scalar_lea.sflag [#allocation3], %s2448_s23 }
 0x63d   : > { %p2639_p0 = pnand %p2642_p13, %p2901_p6 }
 0x63f   : > { %p2640_p1 = pneg %p2639_p0 }
 0x641   : > { %2761 = dma.done.wait (%p2640_p1), %s2449_s26, 512  }
 0x642   : > { %2763 = vsyncadd (%p2640_p1), %s2449_s26, 4294966784  ;;  %s3751_s24 = sld [smem:[#allocation6_spill]]  ;;  %s3754_s21 = smov %s2770_s22 }
 0x643   : > { %s3752_s13 = sld [smem:[#allocation5_spill]] }
 0x644   : > { %s3753_s23 = sld [smem:[#allocation7_spill]] }
 0x648   : > { %p22_p2 = scmp.ge.s32.totalorder %s3751_s24, 4  }
 0x649   : > { %s3755_s22 = smov %s3752_s13 }
 0x64a   :  { %24 = sbr.rel (!%p22_p2) target bundleno = 5 (0x5), region = 103 }
 0x64f   :  { %2454 = vsyncpa [#allocation3], 1 }
 0x650   :  { %2456 = vsyncpa [#allocation3 + $0x1], 1 }

</bundles_post_ra>
